<compile_context>
chip_gen: v7x
topology: tpu7x:2x2x1
jax: 0.10.0
libtpu: 0.0.40
codegen_flags: <defaults>
</compile_context>

<pallas_src>
import functools

import jax
import jax.numpy as jnp
from jax.experimental import pallas as pl
from jax.experimental.pallas import tpu as pltpu

IN_DIM = 640
HID_DIM = 640
OUT_DIM = 5
OUT_PAD = 128                      # lane-dense padded output width
BN_EPS = 1e-5
LEAKY_SLOPE = 0.01
VMEM_LIMIT = 48 * 1024 * 1024      # <= ~48 MiB so tiles also fit v7x (64 MiB VMEM)


def _round_up(x, m):
    return (x + m - 1) // m * m


# --------------------------------------------------------------------------
# Fast path: whole (padded) batch in one grid step.
# --------------------------------------------------------------------------
def _lr_single_kernel(x_ref, w1_ref, b1_ref, gamma_ref, beta_ref, w2_ref,
                      b2_ref, o_ref, *, n_valid, n_pad):
    h = jnp.dot(x_ref[...].astype(jnp.bfloat16), w1_ref[...],
                preferred_element_type=jnp.float32) + b1_ref[...]      # (b,640) f32

    s = jnp.sum(h, axis=0, keepdims=True)
    ss = jnp.sum(h * h, axis=0, keepdims=True)
    if n_pad:   # padded x rows are exactly zero -> their h rows equal b1 exactly
        b1v = b1_ref[...]
        s = s - float(n_pad) * b1v
        ss = ss - float(n_pad) * (b1v * b1v)

    inv_n = 1.0 / float(n_valid)
    mean = s * inv_n
    var = jnp.maximum(ss * inv_n - mean * mean, 0.0)   # biased (training-mode BN)
    scale = gamma_ref[...] * jax.lax.rsqrt(var + BN_EPS)
    shift = beta_ref[...] - mean * scale

    hn = h * scale + shift
    a = jnp.where(hn >= 0.0, hn, LEAKY_SLOPE * hn)
    out = jnp.dot(a.astype(jnp.bfloat16), w2_ref[...],
                  preferred_element_type=jnp.float32) + b2_ref[...]
    o_ref[...] = out.astype(o_ref.dtype)


# --------------------------------------------------------------------------
# Tiled path, kernel A: h = x@W1 + b1, stash h (bf16) + per-tile BN partials.
# --------------------------------------------------------------------------
def _lr_stats_kernel(x_ref, w1_ref, b1_ref, h_ref, part_ref):
    h = jnp.dot(x_ref[...].astype(jnp.bfloat16), w1_ref[...],
                preferred_element_type=jnp.float32) + b1_ref[...]      # (tb,640) f32
    h_ref[...] = h.astype(h_ref.dtype)                                 # bf16 stash
    s = jnp.sum(h, axis=0, keepdims=True)
    ss = jnp.sum(h * h, axis=0, keepdims=True)
    # rows: 0 = sum, 1 = sumsq, 2..7 = zero padding (sublane-aligned block)
    part_ref[...] = jnp.concatenate(
        [s, ss, jnp.zeros((6, s.shape[1]), jnp.float32)], axis=0)


# --------------------------------------------------------------------------
# Tiled path, kernel B: fused BN scale/shift + LeakyReLU + Linear(640, 5).
# --------------------------------------------------------------------------
def _lr_apply_kernel(h_ref, scale_ref, shift_ref, w2_ref, b2_ref, o_ref):
    hn = h_ref[...].astype(jnp.float32) * scale_ref[...] + shift_ref[...]
    a = jnp.where(hn >= 0.0, hn, LEAKY_SLOPE * hn)
    out = jnp.dot(a.astype(jnp.bfloat16), w2_ref[...],
                  preferred_element_type=jnp.float32) + b2_ref[...]
    o_ref[...] = out.astype(o_ref.dtype)


def lr_model_forward(x, w1, b1, gamma, beta, w2, b2, *, block_b=1024):
    """x: (B, 640) f32; weights in (in, out) layout. Returns (B, 5) f32."""
    B = x.shape[0]
    assert x.shape[1] == IN_DIM

    # bf16-resident weights; lane-dense (128-wide) padded second linear.
    w1_b = w1.astype(jnp.bfloat16)
    w2_b = jnp.zeros((HID_DIM, OUT_PAD), jnp.bfloat16).at[:, :OUT_DIM].set(
        w2.astype(jnp.bfloat16))
    b2_p = jnp.zeros((1, OUT_PAD), jnp.float32).at[:, :OUT_DIM].set(b2)

    # ---------------- single-tile fast path ----------------
    if B <= max(block_b, 8):
        b_pad = _round_up(max(B, 8), 8)
        x_p = x if b_pad == B else (
            jnp.zeros((b_pad, IN_DIM), x.dtype).at[:B].set(x))
        kernel = functools.partial(_lr_single_kernel,
                                   n_valid=B, n_pad=b_pad - B)
        out_pad = pl.pallas_call(
            kernel,
            out_shape=jax.ShapeDtypeStruct((b_pad, OUT_PAD), jnp.float32),
            compiler_params=pltpu.CompilerParams(
                vmem_limit_bytes=VMEM_LIMIT),
        )(x_p, w1_b, b1, gamma, beta, w2_b, b2_p)
        return out_pad[:B, :OUT_DIM]

    # ---------------- tiled two-kernel path ----------------
    tb = _round_up(block_b, 16)                 # bf16 h tiles: sublane multiple of 16
    b_pad = _round_up(B, tb)
    nt = b_pad // tb
    n_pad = b_pad - B
    x_p = x if n_pad == 0 else (
        jnp.zeros((b_pad, IN_DIM), x.dtype).at[:B].set(x))

    const = lambda t: (0, 0)                    # weights resident in VMEM
    batch = lambda t: (t, 0)                    # tiled over batch

    h_bf, part = pl.pallas_call(
        _lr_stats_kernel,
        grid=(nt,),
        in_specs=[
            pl.BlockSpec((tb, IN_DIM), batch),         # x (f32, cast in-kernel)
            pl.BlockSpec((IN_DIM, HID_DIM), const),    # w1 (bf16)
            pl.BlockSpec((1, HID_DIM), const),         # b1
        ],
        out_specs=[
            pl.BlockSpec((tb, HID_DIM), batch),        # h stash (bf16)
            pl.BlockSpec((8, HID_DIM), batch),         # per-tile [sum; sumsq; 0..]
        ],
        out_shape=[
            jax.ShapeDtypeStruct((b_pad, HID_DIM), jnp.bfloat16),
            jax.ShapeDtypeStruct((nt * 8, HID_DIM), jnp.float32),
        ],
        compiler_params=pltpu.CompilerParams(
            dimension_semantics=("parallel",),
            vmem_limit_bytes=VMEM_LIMIT),
    )(x_p, w1_b, b1)

    # Tiny cross-tile reduction + fused BN scale/shift (plain XLA, negligible).
    part = part.reshape(nt, 8, HID_DIM)
    total = jnp.sum(part[:, 0, :], axis=0, keepdims=True)    # (1, 640)
    totsq = jnp.sum(part[:, 1, :], axis=0, keepdims=True)
    if n_pad:   # padded x rows are exactly zero -> their h rows equal b1 exactly
        total = total - float(n_pad) * b1
        totsq = totsq - float(n_pad) * (b1 * b1)
    inv_n = 1.0 / float(B)
    mean = total * inv_n
    var = jnp.maximum(totsq * inv_n - mean * mean, 0.0)
    scale = gamma * jax.lax.rsqrt(var + BN_EPS)
    shift = beta - mean * scale

    out_pad = pl.pallas_call(
        _lr_apply_kernel,
        grid=(nt,),
        in_specs=[
            pl.BlockSpec((tb, HID_DIM), batch),        # h (bf16)
            pl.BlockSpec((1, HID_DIM), const),         # scale
            pl.BlockSpec((1, HID_DIM), const),         # shift
            pl.BlockSpec((HID_DIM, OUT_PAD), const),   # w2 (bf16, padded)
            pl.BlockSpec((1, OUT_PAD), const),         # b2 (padded)
        ],
        out_specs=pl.BlockSpec((tb, OUT_PAD), batch),
        out_shape=jax.ShapeDtypeStruct((b_pad, OUT_PAD), jnp.float32),
        compiler_params=pltpu.CompilerParams(
            dimension_semantics=("parallel",),
            vmem_limit_bytes=VMEM_LIMIT),
    )(h_bf, scale, shift, w2_b, b2_p)

    return out_pad[:B, :OUT_DIM]


def lr_model_reference(x, w1, b1, gamma, beta, w2, b2):
    """Pure-JAX f32 reference of the PyTorch forward (training-mode BN)."""
    h = x @ w1 + b1
    mean = jnp.mean(h, axis=0, keepdims=True)
    var = jnp.mean((h - mean) ** 2, axis=0, keepdims=True)
    hn = (h - mean) * jax.lax.rsqrt(var + BN_EPS) * gamma + beta
    a = jnp.where(hn >= 0.0, hn, LEAKY_SLOPE * hn)
    return a @ w2 + b2


def init_params(key):
    """Deterministic parameter init mimicking PyTorch default Linear init."""
    k1, k2, k3, k4 = jax.random.split(key, 4)
    bound1 = 1.0 / (IN_DIM ** 0.5)
    w1 = jax.random.uniform(k1, (IN_DIM, HID_DIM), jnp.float32,
                            minval=-bound1, maxval=bound1)
    b1 = jax.random.uniform(k2, (1, HID_DIM), jnp.float32,
                            minval=-bound1, maxval=bound1)
    gamma = jnp.ones((1, HID_DIM), jnp.float32)   # BatchNorm1d weight init
    beta = jnp.zeros((1, HID_DIM), jnp.float32)   # BatchNorm1d bias init
    bound2 = 1.0 / (HID_DIM ** 0.5)
    w2 = jax.random.uniform(k3, (HID_DIM, OUT_DIM), jnp.float32,
                            minval=-bound2, maxval=bound2)
    b2 = jax.random.uniform(k4, (1, OUT_DIM), jnp.float32,
                            minval=-bound2, maxval=bound2)
    return w1, b1, gamma, beta, w2, b2


if __name__ == "__main__":
    key = jax.random.PRNGKey(0)
    kx, kx2, kp = jax.random.split(key, 3)
    params = init_params(kp)

    # Small batch -> single-pass fast path (BatchNorm1d training mode, B >= 2).
    B = 8
    x = jax.random.normal(kx, (B, IN_DIM), jnp.float32)
    out = lr_model_forward(x, *params)
    jax.block_until_ready(out)
    assert out.shape == (B, OUT_DIM)
    assert out.dtype == jnp.float32
    assert bool(jnp.all(jnp.isfinite(out)))
    ref = lr_model_reference(x, *params)
    # Loose tolerance: kernel matmuls use bf16 inputs (f32 accumulation).
    assert float(jnp.max(jnp.abs(out - ref))) < 0.25

    # Larger, non-tile-aligned batch -> tiled stats/apply path (exercises the
    # bf16 h stash, the cross-tile reduction and the batch-padding fixup).
    B2 = 600
    x2 = jax.random.normal(kx2, (B2, IN_DIM), jnp.float32)
    out2 = lr_model_forward(x2, *params, block_b=256)
    jax.block_until_ready(out2)
    assert out2.shape == (B2, OUT_DIM)
    assert bool(jnp.all(jnp.isfinite(out2)))
    ref2 = lr_model_reference(x2, *params)
    assert float(jnp.max(jnp.abs(out2 - ref2))) < 0.25

    print("KERNEL_OK")
</pallas_src>

<mosaic_0001>
module attributes {stable_mosaic.version = 11 : i64} {
  func.func @_lr_single_kernel(%arg0: memref<8x640xf32, #tpu.memory_space<vmem>>, %arg1: memref<640x640xbf16, #tpu.memory_space<vmem>>, %arg2: memref<1x640xf32, #tpu.memory_space<vmem>>, %arg3: memref<1x640xf32, #tpu.memory_space<vmem>>, %arg4: memref<1x640xf32, #tpu.memory_space<vmem>>, %arg5: memref<640x128xbf16, #tpu.memory_space<vmem>>, %arg6: memref<1x128xf32, #tpu.memory_space<vmem>>, %arg7: memref<8x128xf32, #tpu.memory_space<vmem>>) attributes {dimension_semantics = [], scalar_prefetch = 0 : i64, scratch_operands = 0 : i64, tpu.core_type = #tpu.core_type<tc>} {
    %c0 = arith.constant 0 : index
    %c0_0 = arith.constant 0 : index
    %0 = vector.load %arg0[%c0, %c0_0] : memref<8x640xf32, #tpu.memory_space<vmem>>, vector<8x640xf32>
    %1 = arith.truncf %0 : vector<8x640xf32> to vector<8x640xbf16>
    %c0_1 = arith.constant 0 : index
    %c0_2 = arith.constant 0 : index
    %2 = vector.load %arg1[%c0_1, %c0_2] : memref<640x640xbf16, #tpu.memory_space<vmem>>, vector<640x640xbf16>
    %cst = arith.constant dense<0.000000e+00> : vector<8x640xf32>
    %3 = tpu.matmul %1, %2, %cst {dimension_numbers = #tpu.dot_dimension_numbers<[1], [0], [0], [1], [0, 0, 1, 1], [], []>} : vector<8x640xbf16>, vector<640x640xbf16>, vector<8x640xf32> -> vector<8x640xf32>
    %c0_3 = arith.constant 0 : index
    %c0_4 = arith.constant 0 : index
    %4 = vector.load %arg2[%c0_3, %c0_4] : memref<1x640xf32, #tpu.memory_space<vmem>>, vector<1x640xf32>
    %5 = vector.broadcast %4 : vector<1x640xf32> to vector<8x640xf32>
    %6 = arith.addf %3, %5 : vector<8x640xf32>
    %cst_5 = arith.constant dense<0.000000e+00> : vector<640xf32>
    %7 = vector.multi_reduction <add>, %6, %cst_5 [0] : vector<8x640xf32> to vector<640xf32>
    %8 = vector.shape_cast %7 : vector<640xf32> to vector<1x640xf32>
    %9 = arith.mulf %6, %6 : vector<8x640xf32>
    %cst_6 = arith.constant dense<0.000000e+00> : vector<640xf32>
    %10 = vector.multi_reduction <add>, %9, %cst_6 [0] : vector<8x640xf32> to vector<640xf32>
    %11 = vector.shape_cast %10 : vector<640xf32> to vector<1x640xf32>
    %cst_7 = arith.constant 1.250000e-01 : f32
    %12 = vector.broadcast %cst_7 : f32 to vector<1x640xf32>
    %13 = arith.mulf %8, %12 : vector<1x640xf32>
    %cst_8 = arith.constant 1.250000e-01 : f32
    %14 = vector.broadcast %cst_8 : f32 to vector<1x640xf32>
    %15 = arith.mulf %11, %14 : vector<1x640xf32>
    %16 = arith.mulf %13, %13 : vector<1x640xf32>
    %17 = arith.subf %15, %16 : vector<1x640xf32>
    %cst_9 = arith.constant 0.000000e+00 : f32
    %18 = vector.broadcast %cst_9 : f32 to vector<1x640xf32>
    %19 = arith.maximumf %17, %18 : vector<1x640xf32>
    %c0_10 = arith.constant 0 : index
    %c0_11 = arith.constant 0 : index
    %20 = vector.load %arg3[%c0_10, %c0_11] : memref<1x640xf32, #tpu.memory_space<vmem>>, vector<1x640xf32>
    %cst_12 = arith.constant 9.99999974E-6 : f32
    %21 = vector.broadcast %cst_12 : f32 to vector<1x640xf32>
    %22 = arith.addf %19, %21 : vector<1x640xf32>
    %23 = math.rsqrt %22 : vector<1x640xf32>
    %24 = arith.mulf %20, %23 : vector<1x640xf32>
    %c0_13 = arith.constant 0 : index
    %c0_14 = arith.constant 0 : index
    %25 = vector.load %arg4[%c0_13, %c0_14] : memref<1x640xf32, #tpu.memory_space<vmem>>, vector<1x640xf32>
    %26 = arith.mulf %13, %24 : vector<1x640xf32>
    %27 = arith.subf %25, %26 : vector<1x640xf32>
    %28 = vector.broadcast %24 : vector<1x640xf32> to vector<8x640xf32>
    %29 = arith.mulf %6, %28 : vector<8x640xf32>
    %30 = vector.broadcast %27 : vector<1x640xf32> to vector<8x640xf32>
    %31 = arith.addf %29, %30 : vector<8x640xf32>
    %cst_15 = arith.constant 0.000000e+00 : f32
    %32 = vector.broadcast %cst_15 : f32 to vector<8x640xf32>
    %33 = arith.cmpf oge, %31, %32 : vector<8x640xf32>
    %cst_16 = arith.constant 0.00999999977 : f32
    %34 = vector.broadcast %cst_16 : f32 to vector<8x640xf32>
    %35 = arith.mulf %34, %31 : vector<8x640xf32>
    %36 = arith.select %33, %31, %35 : vector<8x640xi1>, vector<8x640xf32>
    %37 = arith.truncf %36 : vector<8x640xf32> to vector<8x640xbf16>
    %c0_17 = arith.constant 0 : index
    %c0_18 = arith.constant 0 : index
    %38 = vector.load %arg5[%c0_17, %c0_18] : memref<640x128xbf16, #tpu.memory_space<vmem>>, vector<640x128xbf16>
    %cst_19 = arith.constant dense<0.000000e+00> : vector<8x128xf32>
    %39 = tpu.matmul %37, %38, %cst_19 {dimension_numbers = #tpu.dot_dimension_numbers<[1], [0], [0], [1], [0, 0, 1, 1], [], []>} : vector<8x640xbf16>, vector<640x128xbf16>, vector<8x128xf32> -> vector<8x128xf32>
    %c0_20 = arith.constant 0 : index
    %c0_21 = arith.constant 0 : index
    %40 = vector.load %arg6[%c0_20, %c0_21] : memref<1x128xf32, #tpu.memory_space<vmem>>, vector<1x128xf32>
    %41 = vector.broadcast %40 : vector<1x128xf32> to vector<8x128xf32>
    %42 = arith.addf %39, %41 : vector<8x128xf32>
    %c0_22 = arith.constant 0 : index
    %c0_23 = arith.constant 0 : index
    %43 = vector.load %arg7[%c0_22, %c0_23] : memref<8x128xf32, #tpu.memory_space<vmem>>, vector<8x128xf32>
    tpu.vector_store %arg7[%c0_22, %c0_23], %42 {strides = array<i32>} : memref<8x128xf32, #tpu.memory_space<vmem>>, vector<8x128xf32>,
    return
  }
}

</mosaic_0001>

<bundles_post_ra>
// kernel: tpu_custom_call.1
= control target key start
LH: loop header
LB: loop body
LE: loop exit
PB: predicated region body
PF: predicated region fallthrough
CT: control target
= control target key end

     0   :  { %12 = vsyncpa [#allocation3], 0  ;;  %s3595_s0 = inlined_call_operand.hbm [shape: f32[8,640], index: 0, kind: input, shape index: {}]   ;;  %s3596_s1 = inlined_call_operand.hbm [shape: bf16[640,640], index: 1, kind: input, shape index: {}]   ;;  %s3597_s2 = inlined_call_operand.vmem [shape: f32[1,640], index: 2, kind: input, shape index: {}]   ;;  %s3598_s3 = inlined_call_operand.vmem [shape: f32[1,640], index: 3, kind: input, shape index: {}]   ;;  %s3599_s4 = inlined_call_operand.vmem [shape: f32[1,640], index: 4, kind: input, shape index: {}]   ;;  %s3600_s5 = inlined_call_operand.hbm [shape: bf16[640,128], index: 5, kind: input, shape index: {}]   ;;  %s3601_s6 = inlined_call_operand.vmem [shape: f32[1,128], index: 6, kind: input, shape index: {}]   ;;  %s3602_s7 = inlined_call_operand.hbm [shape: f32[8,128], index: 7, kind: output, shape index: {}]  }
   0x1   :  { %13 = vsyncpa [#allocation6], 0 }
   0x2   :  { %14 = vsyncpa [#allocation4], 0  ;;  %s3338_s24 = smov [#allocation5]   ;;  %s3244_s28 = scalar_lea.hbm %s3596_s1, 25600 }
   0x3   :  { %s30_s25 = sshll.u32 %s3338_s24, 4  ;;  %p3245_p0 = scmp.ne.s32.totalorder %s3596_s1, %s3244_s28  ;;  %s31_s25 = int_to_ptr.vmem [resolvable:$true] %s30_s25 }
   0x4   :  { %p3248_p1 = scmp.lt.u32.totalorder %s3244_s28, %s3596_s1 }
   0x6   :  { %p3250_p2 = pnand %p3248_p1, %p3245_p0 }
   0x8   :  { %3253 = shalt.err (!%p3250_p2)
}
   0x9   :  { %s3254_s10 = scalar_lea.vmem %s31_s25, 25600  ;;  %p3259_p4 = scmp.lt.s32.totalorder %s31_s25, %s31_s25 }
   0xa   :  { %p3255_p3 = scmp.ne.s32.totalorder %s31_s25, %s3254_s10  ;;  %p3260_p5 = scmp.lt.s32.totalorder %s3254_s10, %s3254_s10 }
   0xc   :  { %p3261_p6 = por %p3260_p5, %p3259_p4 }
   0xe   :  { %p3262_p7 = pnand %p3261_p6, %p3255_p3 }
  0x10   :  { %3265 = shalt.err (!%p3262_p7)
}
  0x11   :  { %s3339_s11 = smov 320   ;;  %s3340_s12 = smov 20  }
  0x12   :  { %36 = dma.hbm_to_vmem [thread:$0]  %s3596_s1, 25600, %s31_s25, [#allocation6], %s3339_s11, %s3339_s11, %s3340_s12  }
  0x13   :  { %s3341_s15 = smov [#allocation2]   ;;  %s3342_s17 = smov [#allocation7]  }
  0x14   :  { %s21_s16 = sshll.u32 %s3341_s15, 4  ;;  %s48_s18 = sshll.u32 %s3342_s17, 4  ;;  %s22_s16 = int_to_ptr.vmem [resolvable:$true] %s21_s16  ;;  %s49_s18 = int_to_ptr.vmem [resolvable:$true] %s48_s18 }
  0x15   :  { %s3266_s21 = scalar_lea.hbm %s3595_s0, 640 }
  0x16   :  { %p3267_p8 = scmp.ne.s32.totalorder %s3595_s0, %s3266_s21  ;;  %p3270_p9 = scmp.lt.u32.totalorder %s3266_s21, %s3595_s0 }
  0x18   :  { %p3272_p10 = pnand %p3270_p9, %p3267_p8 }
  0x1a   :  { %3275 = shalt.err (!%p3272_p10)
}
  0x1b   :  { %s3276_s1 = scalar_lea.vmem %s22_s16, 640  ;;  %p3281_p12 = scmp.lt.s32.totalorder %s22_s16, %s22_s16 }
  0x1c   :  { %p3277_p11 = scmp.ne.s32.totalorder %s22_s16, %s3276_s1  ;;  %p3282_p13 = scmp.lt.s32.totalorder %s3276_s1, %s3276_s1 }
  0x1e   :  { %p3283_p0 = por %p3282_p13, %p3281_p12 }
  0x20   :  { %p3284_p1 = pnand %p3283_p0, %p3277_p11 }
  0x22   :  { %3287 = shalt.err (!%p3284_p1)
}
  0x23   :  { %24 = dma.hbm_to_vmem [thread:$0]  %s3595_s0, 640, %s22_s16, [#allocation3]  }
  0x24   :  { %s3288_s30 = scalar_lea.hbm %s3600_s5, 5120 }
  0x25   :  { %p3289_p2 = scmp.ne.s32.totalorder %s3600_s5, %s3288_s30  ;;  %p3292_p3 = scmp.lt.u32.totalorder %s3288_s30, %s3600_s5 }
  0x27   :  { %p3294_p4 = pnand %p3292_p3, %p3289_p2 }
  0x29   :  { %3297 = shalt.err (!%p3294_p4)
}
  0x2a   :  { %s3298_s12 = scalar_lea.vmem %s49_s18, 5120  ;;  %p3303_p6 = scmp.lt.s32.totalorder %s49_s18, %s49_s18 }
  0x2b   :  { %p3299_p5 = scmp.ne.s32.totalorder %s49_s18, %s3298_s12  ;;  %p3304_p7 = scmp.lt.s32.totalorder %s3298_s12, %s3298_s12 }
  0x2d   :  { %p3305_p8 = por %p3304_p7, %p3303_p6 }
  0x2f   :  { %p3306_p9 = pnand %p3305_p8, %p3299_p5 }
  0x31   :  { %3309 = shalt.err (!%p3306_p9)
}
  0x32   :  { %s3343_s0 = smov 64   ;;  %s3344_s13 = smov 4  }
  0x33   :  { %54 = dma.hbm_to_vmem [thread:$0]  %s3600_s5, 5120, %s49_s18, [#allocation6], %s3343_s0, %s3343_s0, %s3344_s13  }
  0x34   :  { %3332 = dma.done.wait [#allocation3], 640  }
  0x35   :  { %3333 = vsyncadd [#allocation3], 4294966656 }
  0x36   :  { %3334 = dma.done.wait [#allocation6], 30720  }
  0x37   :  { %3335 = vsyncadd [#allocation6], 4294936576  ;;  %v2914_v0 = vld [vmem:[#allocation5 + $0x4] ss:$20 sps:$4 sm:$0xff]   ;;  %v2916_v1 = vld [vmem:[#allocation5 + $0xc] ss:$20 sps:$4 sm:$0xff]  }
  0x38   :  { %1384 = vmatprep.subr.bf16.mxu0 %v2914_v0  ;;  %v2918_v2 = vld [vmem:[#allocation5] ss:$20 sps:$4 sm:$0xff]   ;;  %v2919_v3 = vld [vmem:[#allocation5 + $0x8] ss:$20 sps:$4 sm:$0xff]   ;;  %1507 = vmatprep.subr.bf16.mxu1 %v2916_v1  ;;  %v2925_v7 = vld [vmem:[#allocation5 + $0x30] ss:$20 sps:$4 sm:$0xff]  }
  0x39   :  { %v2920_v4 = vld [vmem:[#allocation5 + $0x2c] ss:$20 sps:$4 sm:$0xff]   ;;  %1385 = vmatpush1.bf16.msra.mxu0 %v2918_v2  ;;  %1508 = vmatpush1.bf16.msra.mxu1 %v2919_v3  ;;  %v2922_v5 = vld [vmem:[#allocation5 + $0x34] ss:$20 sps:$4 sm:$0xff]   ;;  %v2928_v9 = vld [vmem:[#allocation5 + $0x5c] ss:$20 sps:$4 sm:$0xff]  }
  0x3a   :  { %v2924_v6 = vld [vmem:[#allocation5 + $0x28] ss:$20 sps:$4 sm:$0xff]   ;;  %1386 = vmatprep.subr.bf16.mxu0 %v2920_v4  ;;  %1509 = vmatprep.subr.bf16.mxu1 %v2922_v5  ;;  %v2930_v10 = vld [vmem:[#allocation5 + $0x50] ss:$20 sps:$4 sm:$0xff]   ;;  %v2931_v11 = vld [vmem:[#allocation5 + $0x58] ss:$20 sps:$4 sm:$0xff]  }
  0x3b   :  { %v2926_v8 = vld [vmem:[#allocation5 + $0x54] ss:$20 sps:$4 sm:$0xff]   ;;  %v2932_v12 = vld [vmem:[#allocation5 + $0x7c] ss:$20 sps:$4 sm:$0xff]   ;;  %v2934_v13 = vld [vmem:[#allocation5 + $0x84] ss:$20 sps:$4 sm:$0xff]  }
  0x3c   :  { %v2936_v14 = vld [vmem:[#allocation5 + $0x78] ss:$20 sps:$4 sm:$0xff]   ;;  %v2937_v15 = vld [vmem:[#allocation5 + $0x80] ss:$20 sps:$4 sm:$0xff]   ;;  %v2943_v19 = vld [vmem:[#allocation5 + $0xa8] ss:$20 sps:$4 sm:$0xff]  }
  0x3d   :  { %1387 = vmatpush1.bf16.msra.mxu0 %v2924_v6  ;;  %1510 = vmatpush1.bf16.msra.mxu1 %v2925_v7  ;;  %v2938_v16 = vld [vmem:[#allocation5 + $0xa4] ss:$20 sps:$4 sm:$0xff]   ;;  %v2940_v17 = vld [vmem:[#allocation5 + $0xac] ss:$20 sps:$4 sm:$0xff]   ;;  %v2946_v21 = vld [vmem:[#allocation5 + $0xd4] ss:$20 sps:$4 sm:$0xff]  }
  0x3e   :  { %1388 = vmatprep.subr.bf16.mxu0 %v2926_v8  ;;  %1511 = vmatprep.subr.bf16.mxu1 %v2928_v9  ;;  %v2942_v18 = vld [vmem:[#allocation5 + $0xa0] ss:$20 sps:$4 sm:$0xff]   ;;  %v2948_v22 = vld [vmem:[#allocation5 + $0xc8] ss:$20 sps:$4 sm:$0xff]   ;;  %v2949_v23 = vld [vmem:[#allocation5 + $0xd0] ss:$20 sps:$4 sm:$0xff]  }
  0x3f   :  { %v2944_v20 = vld [vmem:[#allocation5 + $0xcc] ss:$20 sps:$4 sm:$0xff]   ;;  %v2950_v24 = vld [vmem:[#allocation5 + $0xf4] ss:$20 sps:$4 sm:$0xff]   ;;  %v2952_v25 = vld [vmem:[#allocation5 + $0xfc] ss:$20 sps:$4 sm:$0xff]  }
  0x40   :  { %v2954_v26 = vld [vmem:[#allocation5 + $0xf0] ss:$20 sps:$4 sm:$0xff]   ;;  %v2955_v27 = vld [vmem:[#allocation5 + $0xf8] ss:$20 sps:$4 sm:$0xff]   ;;  %v2961_v31 = vld [vmem:[#allocation5 + $0x120] ss:$20 sps:$4 sm:$0xff]  }
  0x41   :  { %1389 = vmatpush1.bf16.msra.mxu0 %v2930_v10  ;;  %1512 = vmatpush1.bf16.msra.mxu1 %v2931_v11  ;;  %v2956_v28 = vld [vmem:[#allocation5 + $0x11c] ss:$20 sps:$4 sm:$0xff]   ;;  %v2958_v29 = vld [vmem:[#allocation5 + $0x124] ss:$20 sps:$4 sm:$0xff]   ;;  %v2964_v33 = vld [vmem:[#allocation5 + $0x14c] ss:$20 sps:$4 sm:$0xff]  }
  0x42   :  { %1390 = vmatprep.subr.bf16.mxu0 %v2932_v12  ;;  %1513 = vmatprep.subr.bf16.mxu1 %v2934_v13  ;;  %v2960_v30 = vld [vmem:[#allocation5 + $0x118] ss:$20 sps:$4 sm:$0xff]   ;;  %v2966_v34 = vld [vmem:[#allocation5 + $0x140] ss:$20 sps:$4 sm:$0xff]   ;;  %v2967_v35 = vld [vmem:[#allocation5 + $0x148] ss:$20 sps:$4 sm:$0xff]  }
  0x43   :  { %v2962_v32 = vld [vmem:[#allocation5 + $0x144] ss:$20 sps:$4 sm:$0xff]   ;;  %v2968_v36 = vld [vmem:[#allocation5 + $0x16c] ss:$20 sps:$4 sm:$0xff]   ;;  %v2970_v37 = vld [vmem:[#allocation5 + $0x174] ss:$20 sps:$4 sm:$0xff]  }
  0x44   :  { %v2972_v38 = vld [vmem:[#allocation5 + $0x168] ss:$20 sps:$4 sm:$0xff]   ;;  %v2973_v39 = vld [vmem:[#allocation5 + $0x170] ss:$20 sps:$4 sm:$0xff]   ;;  %v2979_v43 = vld [vmem:[#allocation5 + $0x198] ss:$20 sps:$4 sm:$0xff]  }
  0x45   :  { %1391 = vmatpush1.bf16.msra.mxu0 %v2936_v14  ;;  %1514 = vmatpush1.bf16.msra.mxu1 %v2937_v15  ;;  %v2974_v40 = vld [vmem:[#allocation5 + $0x194] ss:$20 sps:$4 sm:$0xff]   ;;  %v2976_v41 = vld [vmem:[#allocation5 + $0x19c] ss:$20 sps:$4 sm:$0xff]   ;;  %v2982_v45 = vld [vmem:[#allocation5 + $0x1c4] ss:$20 sps:$4 sm:$0xff]  }
  0x46   :  { %1392 = vmatprep.subr.bf16.mxu0 %v2938_v16  ;;  %1515 = vmatprep.subr.bf16.mxu1 %v2940_v17  ;;  %v2978_v42 = vld [vmem:[#allocation5 + $0x190] ss:$20 sps:$4 sm:$0xff]   ;;  %v2984_v47 = vld [vmem:[#allocation5 + $0x1b8] ss:$20 sps:$4 sm:$0xff]   ;;  %v2985_v49 = vld [vmem:[#allocation5 + $0x1c0] ss:$20 sps:$4 sm:$0xff]  }
  0x47   :  { %v2980_v44 = vld [vmem:[#allocation5 + $0x1bc] ss:$20 sps:$4 sm:$0xff]   ;;  %v68_v46 = vld [vmem:[#allocation2 + $0x8] sm:$0xff]  ;;  %v2994_v55 = vld [vmem:[#allocation5 + $0x214] ss:$20 sps:$4 sm:$0xff]   ;;  %vm3347_vm0 = vmmov 0  }
  0x48   :  { %v3426_v48 = vpack.c.bf16 %v68_v46, %v68_v46  ;;  %v2986_v50 = vld [vmem:[#allocation5 + $0x1e4] ss:$20 sps:$4 sm:$0xff]   ;;  %v2988_v51 = vld [vmem:[#allocation5 + $0x1ec] ss:$20 sps:$4 sm:$0xff]   ;;  %v2991_v53 = vld [vmem:[#allocation5 + $0x1e8] ss:$20 sps:$4 sm:$0xff]  }
  0x49   :  { %1393 = vmatpush1.bf16.msra.mxu0 %v2942_v18  ;;  %1516 = vmatpush1.bf16.msra.mxu1 %v2943_v19  ;;  %v2990_v52 = vld [vmem:[#allocation5 + $0x1e0] ss:$20 sps:$4 sm:$0xff]   ;;  %v2996_v56 = vld [vmem:[#allocation5 + $0x208] ss:$20 sps:$4 sm:$0xff]   ;;  %v2997_v57 = vld [vmem:[#allocation5 + $0x210] ss:$20 sps:$4 sm:$0xff]  }
  0x4a   :  { %1394 = vmatprep.subr.bf16.mxu0 %v2944_v20  ;;  %1517 = vmatprep.subr.bf16.mxu1 %v2946_v21  ;;  %v2992_v54 = vld [vmem:[#allocation5 + $0x20c] ss:$20 sps:$4 sm:$0xff]   ;;  %v2998_v58 = vld [vmem:[#allocation5 + $0x234] ss:$20 sps:$4 sm:$0xff]   ;;  %v3000_v59 = vld [vmem:[#allocation5 + $0x23c] ss:$20 sps:$4 sm:$0xff]  }
  0x4b   :  { %1416 = vmatprep.mubr.bf16.mxu0 %v3426_v48  ;;  %1539 = vmatprep.mubr.bf16.mxu1 %v3426_v48  ;;  %v3002_v60 = vld [vmem:[#allocation5 + $0x230] ss:$20 sps:$4 sm:$0xff]   ;;  %v3003_v61 = vld [vmem:[#allocation5 + $0x238] ss:$20 sps:$4 sm:$0xff]   ;;  %v3009_v1 = vld [vmem:[#allocation5 + $0x260] ss:$20 sps:$4 sm:$0xff]  }
  0x4c   :  { %v3004_v62 = vld [vmem:[#allocation5 + $0x25c] ss:$20 sps:$4 sm:$0xff]   ;;  %v3006_v63 = vld [vmem:[#allocation5 + $0x264] ss:$20 sps:$4 sm:$0xff]   ;;  %v3015_v4 = vld [vmem:[#allocation5 + $0x28c] ss:$20 sps:$4 sm:$0xff]  }
  0x4d   :  { %1395 = vmatpush1.bf16.msra.mxu0 %v2948_v22  ;;  %1518 = vmatpush1.bf16.msra.mxu1 %v2949_v23  ;;  %v3008_v0 = vld [vmem:[#allocation5 + $0x258] ss:$20 sps:$4 sm:$0xff]   ;;  %v3010_v6 = vld [vmem:[#allocation5 + $0x280] ss:$20 sps:$4 sm:$0xff]   ;;  %v3013_v7 = vld [vmem:[#allocation5 + $0x288] ss:$20 sps:$4 sm:$0xff]  }
  0x4e   :  { %1396 = vmatprep.subr.bf16.mxu0 %v2950_v24  ;;  %1519 = vmatprep.subr.bf16.mxu1 %v2952_v25  ;;  %v67_v2 = vld [vmem:[#allocation2] sm:$0xff]  ;;  %v3018_v8 = vld [vmem:[#allocation5 + $0x2ac] ss:$20 sps:$4 sm:$0xff]   ;;  %v3021_v9 = vld [vmem:[#allocation5 + $0x2b4] ss:$20 sps:$4 sm:$0xff]   ;;  %s3349_s20 = smov [#allocation8]  }
  0x4f   :  { %v3012_v3 = vld [vmem:[#allocation5 + $0x284] ss:$20 sps:$4 sm:$0xff]   ;;  %v3430_v5 = vpack.c.bf16 %v67_v2, %v67_v2  ;;  %v3016_v10 = vld [vmem:[#allocation5 + $0x2a8] ss:$20 sps:$4 sm:$0xff]   ;;  %v3031_v19 = vld [vmem:[#allocation5 + $0x300] ss:$20 sps:$4 sm:$0xff]  }
  0x50   :  { %v3019_v11 = vld [vmem:[#allocation5 + $0x2b0] ss:$20 sps:$4 sm:$0xff]   ;;  %v3024_v12 = vld [vmem:[#allocation5 + $0x2d4] ss:$20 sps:$4 sm:$0xff]   ;;  %v3025_v15 = vld [vmem:[#allocation5 + $0x2d8] ss:$20 sps:$4 sm:$0xff]  }
  0x51   :  { %1397 = vmatpush1.bf16.msra.mxu0 %v2954_v26  ;;  %1520 = vmatpush1.bf16.msra.mxu1 %v2955_v27  ;;  %v3027_v13 = vld [vmem:[#allocation5 + $0x2dc] ss:$20 sps:$4 sm:$0xff]   ;;  %v3033_v17 = vld [vmem:[#allocation5 + $0x304] ss:$20 sps:$4 sm:$0xff]   ;;  %v3039_v21 = vld [vmem:[#allocation5 + $0x32c] ss:$20 sps:$4 sm:$0xff]  }
  0x52   :  { %1398 = vmatprep.subr.bf16.mxu0 %v2956_v28  ;;  %1521 = vmatprep.subr.bf16.mxu1 %v2958_v29  ;;  %v3022_v14 = vld [vmem:[#allocation5 + $0x2d0] ss:$20 sps:$4 sm:$0xff]   ;;  %v3028_v18 = vld [vmem:[#allocation5 + $0x2f8] ss:$20 sps:$4 sm:$0xff]   ;;  %v3034_v22 = vld [vmem:[#allocation5 + $0x320] ss:$20 sps:$4 sm:$0xff]  }
  0x53   :  { %v3030_v16 = vld [vmem:[#allocation5 + $0x2fc] ss:$20 sps:$4 sm:$0xff]   ;;  %v3036_v20 = vld [vmem:[#allocation5 + $0x324] ss:$20 sps:$4 sm:$0xff]   ;;  %v3042_v24 = vld [vmem:[#allocation5 + $0x34c] ss:$20 sps:$4 sm:$0xff]  }
  0x54   :  { %v3037_v23 = vld [vmem:[#allocation5 + $0x328] ss:$20 sps:$4 sm:$0xff]   ;;  %v3043_v27 = vld [vmem:[#allocation5 + $0x350] ss:$20 sps:$4 sm:$0xff]   ;;  %v3097_v2 = vld [vmem:[#allocation5 + $0x4b8] ss:$20 sps:$4 sm:$0xff]  }
  0x55   :  { %1399 = vmatpush1.bf16.msra.mxu0 %v2960_v30  ;;  %1522 = vmatpush1.bf16.msra.mxu1 %v2961_v31  ;;  %v3045_v25 = vld [vmem:[#allocation5 + $0x354] ss:$20 sps:$4 sm:$0xff]   ;;  %v3051_v29 = vld [vmem:[#allocation5 + $0x37c] ss:$20 sps:$4 sm:$0xff]   ;;  %s2485_s21 = sshll.u32 %s3349_s20, 4  ;;  %s2486_s21 = int_to_ptr.vmem [resolvable:$true] %s2485_s21 }
  0x56   :  { %1400 = vmatprep.subr.bf16.mxu0 %v2962_v32  ;;  %1523 = vmatprep.subr.bf16.mxu1 %v2964_v33  ;;  %v3040_v26 = vld [vmem:[#allocation5 + $0x348] ss:$20 sps:$4 sm:$0xff]   ;;  %v70_v30 = vld [vmem:[#allocation2 + $0x18] sm:$0xff]  ;;  %v3049_v33 = vld [vmem:[#allocation5 + $0x378] ss:$20 sps:$4 sm:$0xff]   ;;  %p3315_p11 = scmp.lt.s32.totalorder %s2486_s21, %s2486_s21 }
  0x57   :  { %v3048_v28 = vld [vmem:[#allocation5 + $0x374] ss:$20 sps:$4 sm:$0xff]   ;;  %v3046_v31 = vld [vmem:[#allocation5 + $0x370] ss:$20 sps:$4 sm:$0xff]   ;;  %v3434_v32 = vpack.c.bf16 %v70_v30, %v70_v30 }
  0x58   :  { %v3072_v46 = vld [vmem:[#allocation5 + $0x414] ss:$20 sps:$4 sm:$0xff]  }
  0x59   :  { %1401 = vmatpush1.bf16.msra.mxu0 %v2966_v34  ;;  %1524 = vmatpush1.bf16.msra.mxu1 %v2967_v35  ;;  %v3054_v34 = vld [vmem:[#allocation5 + $0x39c] ss:$20 sps:$4 sm:$0xff]   ;;  %v3057_v35 = vld [vmem:[#allocation5 + $0x3a4] ss:$20 sps:$4 sm:$0xff]  }
  0x5a   :  { %1402 = vmatprep.subr.bf16.mxu0 %v2968_v36  ;;  %1525 = vmatprep.subr.bf16.mxu1 %v2970_v37  ;;  %v3052_v36 = vld [vmem:[#allocation5 + $0x398] ss:$20 sps:$4 sm:$0xff]   ;;  %v3055_v37 = vld [vmem:[#allocation5 + $0x3a0] ss:$20 sps:$4 sm:$0xff]   ;;  %v3133_v30 = vld [vmem:[#allocation5 + $0x5a8] ss:$20 sps:$4 sm:$0xff]  }
  0x5d   :  { %1403 = vmatpush1.bf16.msra.mxu0 %v2972_v38  ;;  %1526 = vmatpush1.bf16.msra.mxu1 %v2973_v39  ;;  %v3060_v38 = vld [vmem:[#allocation5 + $0x3c4] ss:$20 sps:$4 sm:$0xff]   ;;  %v3063_v39 = vld [vmem:[#allocation5 + $0x3cc] ss:$20 sps:$4 sm:$0xff]  }
  0x5e   :  { %1404 = vmatprep.subr.bf16.mxu0 %v2974_v40  ;;  %1527 = vmatprep.subr.bf16.mxu1 %v2976_v41  ;;  %v3058_v40 = vld [vmem:[#allocation5 + $0x3c0] ss:$20 sps:$4 sm:$0xff]   ;;  %v3061_v41 = vld [vmem:[#allocation5 + $0x3c8] ss:$20 sps:$4 sm:$0xff]  }
  0x61   :  { %1405 = vmatpush1.bf16.msra.mxu0 %v2978_v42  ;;  %1528 = vmatpush1.bf16.msra.mxu1 %v2979_v43  ;;  %v3066_v42 = vld [vmem:[#allocation5 + $0x3ec] ss:$20 sps:$4 sm:$0xff]   ;;  %v3069_v43 = vld [vmem:[#allocation5 + $0x3f4] ss:$20 sps:$4 sm:$0xff]  }
  0x62   :  { %1406 = vmatprep.subr.bf16.mxu0 %v2980_v44  ;;  %1529 = vmatprep.subr.bf16.mxu1 %v2982_v45  ;;  %v3064_v44 = vld [vmem:[#allocation5 + $0x3e8] ss:$20 sps:$4 sm:$0xff]   ;;  %v3067_v45 = vld [vmem:[#allocation5 + $0x3f0] ss:$20 sps:$4 sm:$0xff]  }
  0x65   :  { %1407 = vmatpush1.bf16.msra.mxu0 %v2984_v47  ;;  %1530 = vmatpush1.bf16.msra.mxu1 %v2985_v49  ;;  %v3075_v47 = vld [vmem:[#allocation5 + $0x41c] ss:$20 sps:$4 sm:$0xff]  }
  0x66   :  { %1408 = vmatprep.subr.bf16.mxu0 %v2986_v50  ;;  %1531 = vmatprep.subr.bf16.mxu1 %v2988_v51  ;;  %v3070_v49 = vld [vmem:[#allocation5 + $0x410] ss:$20 sps:$4 sm:$0xff]   ;;  %v3073_v50 = vld [vmem:[#allocation5 + $0x418] ss:$20 sps:$4 sm:$0xff]  }
  0x67   :  { %v3078_v51 = vld [vmem:[#allocation5 + $0x43c] ss:$20 sps:$4 sm:$0xff]  }
  0x69   :  { %1409 = vmatpush1.bf16.msra.mxu0 %v2990_v52  ;;  %1532 = vmatpush1.bf16.msra.mxu1 %v2991_v53  ;;  %v3081_v52 = vld [vmem:[#allocation5 + $0x444] ss:$20 sps:$4 sm:$0xff]  }
  0x6a   :  { %1410 = vmatprep.subr.bf16.mxu0 %v2992_v54  ;;  %1533 = vmatprep.subr.bf16.mxu1 %v2994_v55  ;;  %v3076_v53 = vld [vmem:[#allocation5 + $0x438] ss:$20 sps:$4 sm:$0xff]   ;;  %v3079_v54 = vld [vmem:[#allocation5 + $0x440] ss:$20 sps:$4 sm:$0xff]  }
  0x6b   :  { %v3084_v55 = vld [vmem:[#allocation5 + $0x464] ss:$20 sps:$4 sm:$0xff]  }
  0x6d   :  { %1411 = vmatpush1.bf16.msra.mxu0 %v2996_v56  ;;  %1534 = vmatpush1.bf16.msra.mxu1 %v2997_v57  ;;  %v3087_v56 = vld [vmem:[#allocation5 + $0x46c] ss:$20 sps:$4 sm:$0xff]  }
  0x6e   :  { %1412 = vmatprep.subr.bf16.mxu0 %v2998_v58  ;;  %1535 = vmatprep.subr.bf16.mxu1 %v3000_v59  ;;  %v3082_v57 = vld [vmem:[#allocation5 + $0x460] ss:$20 sps:$4 sm:$0xff]   ;;  %v3085_v58 = vld [vmem:[#allocation5 + $0x468] ss:$20 sps:$4 sm:$0xff]  }
  0x6f   :  { %v3090_v59 = vld [vmem:[#allocation5 + $0x48c] ss:$20 sps:$4 sm:$0xff]  }
  0x71   :  { %1413 = vmatpush1.bf16.msra.mxu0 %v3002_v60  ;;  %1536 = vmatpush1.bf16.msra.mxu1 %v3003_v61  ;;  %v3093_v60 = vld [vmem:[#allocation5 + $0x494] ss:$20 sps:$4 sm:$0xff]  }
  0x72   :  { %1414 = vmatprep.subr.bf16.mxu0 %v3004_v62  ;;  %1537 = vmatprep.subr.bf16.mxu1 %v3006_v63  ;;  %v3088_v61 = vld [vmem:[#allocation5 + $0x488] ss:$20 sps:$4 sm:$0xff]   ;;  %v3091_v62 = vld [vmem:[#allocation5 + $0x490] ss:$20 sps:$4 sm:$0xff]  }
  0x73   :  { %v3096_v63 = vld [vmem:[#allocation5 + $0x4b4] ss:$20 sps:$4 sm:$0xff]  }
  0x75   :  { %1415 = vmatpush1.bf16.msra.mxu0 %v3008_v0  ;;  %1538 = vmatpush1.bf16.msra.mxu1 %v3009_v1  ;;  %v3099_v0 = vld [vmem:[#allocation5 + $0x4bc] ss:$20 sps:$4 sm:$0xff]  }
  0x76   :  { %1425 = vmatprep.subr.bf16.mxu0 %v3012_v3  ;;  %1548 = vmatprep.subr.bf16.mxu1 %v3015_v4  ;;  %v3094_v1 = vld [vmem:[#allocation5 + $0x4b0] ss:$20 sps:$4 sm:$0xff]  }
  0x77   :  { %v3102_v3 = vld [vmem:[#allocation5 + $0x4dc] ss:$20 sps:$4 sm:$0xff]   ;;  %v3105_v4 = vld [vmem:[#allocation5 + $0x4e4] ss:$20 sps:$4 sm:$0xff]  }
  0x78   :  { %1417 = vmatmul.mubr.bf16.vlgmr.msra.gmra.mrb[0].mxu0 %v3430_v5  ;;  %1540 = vmatmul.mubr.bf16.vlgmr.msra.gmra.mrb[0].mxu1 %v3430_v5 }
  0x79   :  { %1426 = vmatpush1.bf16.msra.mxu0 %v3010_v6  ;;  %1549 = vmatpush1.bf16.msra.mxu1 %v3013_v7  ;;  %v3100_v6 = vld [vmem:[#allocation5 + $0x4d8] ss:$20 sps:$4 sm:$0xff]   ;;  %v3103_v7 = vld [vmem:[#allocation5 + $0x4e0] ss:$20 sps:$4 sm:$0xff]  }
  0x7a   :  { %1427 = vmatprep.subr.bf16.mxu0 %v3018_v8  ;;  %1550 = vmatprep.subr.bf16.mxu1 %v3021_v9  ;;  %v3108_v8 = vld [vmem:[#allocation5 + $0x504] ss:$20 sps:$4 sm:$0xff]   ;;  %v69_v9 = vld [vmem:[#allocation2 + $0x10] sm:$0xff] }
  0x7b   :  { %1457 = vmatprep.mubr.bf16.mxu0 %v3434_v32  ;;  %1580 = vmatprep.mubr.bf16.mxu1 %v3434_v32 }
  0x7d   :  { %1428 = vmatpush1.bf16.msra.mxu0 %v3016_v10  ;;  %1551 = vmatpush1.bf16.msra.mxu1 %v3019_v11  ;;  %v3111_v10 = vld [vmem:[#allocation5 + $0x50c] ss:$20 sps:$4 sm:$0xff]  }
  0x7e   :  { %1429 = vmatprep.subr.bf16.mxu0 %v3024_v12  ;;  %1552 = vmatprep.subr.bf16.mxu1 %v3027_v13  ;;  %v3106_v11 = vld [vmem:[#allocation5 + $0x500] ss:$20 sps:$4 sm:$0xff]   ;;  %v3109_v12 = vld [vmem:[#allocation5 + $0x508] ss:$20 sps:$4 sm:$0xff]   ;;  %v3438_v13 = vpack.c.bf16 %v69_v9, %v69_v9 }
  0x7f   :  { %v3181_v9 = vld [vmem:[#allocation5 + $0x380] ss:$20 sps:$4 sm:$0xff]  }
  0x81   :  { %1430 = vmatpush1.bf16.msra.mxu0 %v3022_v14  ;;  %1553 = vmatpush1.bf16.msra.mxu1 %v3025_v15  ;;  %v3114_v14 = vld [vmem:[#allocation5 + $0x52c] ss:$20 sps:$4 sm:$0xff]   ;;  %v3117_v15 = vld [vmem:[#allocation5 + $0x534] ss:$20 sps:$4 sm:$0xff]  }
  0x82   :  { %1431 = vmatprep.subr.bf16.mxu0 %v3030_v16  ;;  %1554 = vmatprep.subr.bf16.mxu1 %v3033_v17  ;;  %v3112_v16 = vld [vmem:[#allocation5 + $0x528] ss:$20 sps:$4 sm:$0xff]   ;;  %v3115_v17 = vld [vmem:[#allocation5 + $0x530] ss:$20 sps:$4 sm:$0xff]  }
  0x85   :  { %1432 = vmatpush1.bf16.msra.mxu0 %v3028_v18  ;;  %1555 = vmatpush1.bf16.msra.mxu1 %v3031_v19  ;;  %v3120_v18 = vld [vmem:[#allocation5 + $0x554] ss:$20 sps:$4 sm:$0xff]   ;;  %v3123_v19 = vld [vmem:[#allocation5 + $0x55c] ss:$20 sps:$4 sm:$0xff]  }
  0x86   :  { %1433 = vmatprep.subr.bf16.mxu0 %v3036_v20  ;;  %1556 = vmatprep.subr.bf16.mxu1 %v3039_v21  ;;  %v3118_v20 = vld [vmem:[#allocation5 + $0x550] ss:$20 sps:$4 sm:$0xff]   ;;  %v3345_v21 = vmov 0  }
  0x89   :  { %1434 = vmatpush1.bf16.msra.mxu0 %v3034_v22  ;;  %1557 = vmatpush1.bf16.msra.mxu1 %v3037_v23  ;;  %v3121_v22 = vld [vmem:[#allocation5 + $0x558] ss:$20 sps:$4 sm:$0xff]   ;;  %v3126_v23 = vld [vmem:[#allocation5 + $0x57c] ss:$20 sps:$4 sm:$0xff]  }
  0x8a   :  { %1435 = vmatprep.subr.bf16.mxu0 %v3042_v24  ;;  %1558 = vmatprep.subr.bf16.mxu1 %v3045_v25  ;;  %v3129_v24 = vld [vmem:[#allocation5 + $0x584] ss:$20 sps:$4 sm:$0xff]  }
  0x8b   :  { %v3124_v25 = vld [vmem:[#allocation5 + $0x578] ss:$20 sps:$4 sm:$0xff]  }
  0x8d   :  { %1436 = vmatpush1.bf16.msra.mxu0 %v3040_v26  ;;  %1559 = vmatpush1.bf16.msra.mxu1 %v3043_v27  ;;  %v3127_v26 = vld [vmem:[#allocation5 + $0x580] ss:$20 sps:$4 sm:$0xff]   ;;  %v3132_v27 = vld [vmem:[#allocation5 + $0x5a4] ss:$20 sps:$4 sm:$0xff]  }
  0x8e   :  { %1437 = vmatprep.subr.bf16.mxu0 %v3048_v28  ;;  %1560 = vmatprep.subr.bf16.mxu1 %v3051_v29  ;;  %v3135_v28 = vld [vmem:[#allocation5 + $0x5ac] ss:$20 sps:$4 sm:$0xff]  }
  0x8f   :  { %v3130_v29 = vld [vmem:[#allocation5 + $0x5a0] ss:$20 sps:$4 sm:$0xff]  }
  0x91   :  { %1438 = vmatpush1.bf16.msra.mxu0 %v3046_v31  ;;  %1561 = vmatpush1.bf16.msra.mxu1 %v3049_v33  ;;  %v3138_v31 = vld [vmem:[#allocation5 + $0x5cc] ss:$20 sps:$4 sm:$0xff]   ;;  %v3141_v33 = vld [vmem:[#allocation5 + $0x5d4] ss:$20 sps:$4 sm:$0xff]  }
  0x92   :  { %1439 = vmatprep.subr.bf16.mxu0 %v3054_v34  ;;  %1562 = vmatprep.subr.bf16.mxu1 %v3057_v35  ;;  %v3136_v34 = vld [vmem:[#allocation5 + $0x5c8] ss:$20 sps:$4 sm:$0xff]   ;;  %v3139_v35 = vld [vmem:[#allocation5 + $0x5d0] ss:$20 sps:$4 sm:$0xff]  }
  0x95   :  { %1440 = vmatpush1.bf16.msra.mxu0 %v3052_v36  ;;  %1563 = vmatpush1.bf16.msra.mxu1 %v3055_v37  ;;  %v3144_v36 = vld [vmem:[#allocation5 + $0x5f4] ss:$20 sps:$4 sm:$0xff]   ;;  %v3147_v37 = vld [vmem:[#allocation5 + $0x5fc] ss:$20 sps:$4 sm:$0xff]  }
  0x96   :  { %1441 = vmatprep.subr.bf16.mxu0 %v3060_v38  ;;  %1564 = vmatprep.subr.bf16.mxu1 %v3063_v39  ;;  %v3142_v38 = vld [vmem:[#allocation5 + $0x5f0] ss:$20 sps:$4 sm:$0xff]   ;;  %v3145_v39 = vld [vmem:[#allocation5 + $0x5f8] ss:$20 sps:$4 sm:$0xff]  }
  0x99   :  { %1442 = vmatpush1.bf16.msra.mxu0 %v3058_v40  ;;  %1565 = vmatpush1.bf16.msra.mxu1 %v3061_v41  ;;  %v3150_v40 = vld [vmem:[#allocation5 + $0x61c] ss:$20 sps:$4 sm:$0xff]   ;;  %v3153_v41 = vld [vmem:[#allocation5 + $0x624] ss:$20 sps:$4 sm:$0xff]  }
  0x9a   :  { %1443 = vmatprep.subr.bf16.mxu0 %v3066_v42  ;;  %1566 = vmatprep.subr.bf16.mxu1 %v3069_v43  ;;  %v3148_v42 = vld [vmem:[#allocation5 + $0x618] ss:$20 sps:$4 sm:$0xff]   ;;  %v3151_v43 = vld [vmem:[#allocation5 + $0x620] ss:$20 sps:$4 sm:$0xff]  }
  0x9d   :  { %1444 = vmatpush1.bf16.msra.mxu0 %v3064_v44  ;;  %1567 = vmatpush1.bf16.msra.mxu1 %v3067_v45  ;;  %v71_v44 = vld [vmem:[#allocation2 + $0x20] sm:$0xff]  ;;  %v3154_v45 = vld [vmem:[#allocation5 + $0x150] ss:$20 sps:$4 sm:$0xff]  }
  0x9e   :  { %1445 = vmatprep.subr.bf16.mxu0 %v3072_v46  ;;  %1568 = vmatprep.subr.bf16.mxu1 %v3075_v47  ;;  %v3156_v46 = vld [vmem:[#allocation5 + $0x3d0] ss:$20 sps:$4 sm:$0xff]  }
  0x9f   :  { %v3155_v47 = vld [vmem:[#allocation5 + $0x10] ss:$20 sps:$4 sm:$0xff]  }
  0xa1   :  { %1446 = vmatpush1.bf16.msra.mxu0 %v3070_v49  ;;  %1569 = vmatpush1.bf16.msra.mxu1 %v3073_v50  ;;  %v3157_v49 = vld [vmem:[#allocation5 + $0x290] ss:$20 sps:$4 sm:$0xff]   ;;  %v3442_v50 = vpack.c.bf16 %v71_v44, %v71_v44 }
  0xa2   :  { %1447 = vmatprep.subr.bf16.mxu0 %v3078_v51  ;;  %1570 = vmatprep.subr.bf16.mxu1 %v3081_v52  ;;  %v3158_v51 = vld [vmem:[#allocation5 + $0x178] ss:$20 sps:$4 sm:$0xff]   ;;  %v3213_v44 = vld [vmem:[#allocation7 + $0xa0] sm:$0xff]  }
  0xa3   :  { %v3160_v52 = vld [vmem:[#allocation5 + $0x3f8] ss:$20 sps:$4 sm:$0xff]  }
  0xa5   :  { %1448 = vmatpush1.bf16.msra.mxu0 %v3076_v53  ;;  %1571 = vmatpush1.bf16.msra.mxu1 %v3079_v54  ;;  %v3159_v53 = vld [vmem:[#allocation5 + $0x38] ss:$20 sps:$4 sm:$0xff]  }
  0xa6   :  { %1449 = vmatprep.subr.bf16.mxu0 %v3084_v55  ;;  %1572 = vmatprep.subr.bf16.mxu1 %v3087_v56  ;;  %v3161_v54 = vld [vmem:[#allocation5 + $0x2b8] ss:$20 sps:$4 sm:$0xff]   ;;  %v3162_v55 = vld [vmem:[#allocation5 + $0x1a0] ss:$20 sps:$4 sm:$0xff]  }
  0xa7   :  { %v3164_v56 = vld [vmem:[#allocation5 + $0x420] ss:$20 sps:$4 sm:$0xff]  }
  0xa9   :  { %1450 = vmatpush1.bf16.msra.mxu0 %v3082_v57  ;;  %1573 = vmatpush1.bf16.msra.mxu1 %v3085_v58  ;;  %v3163_v57 = vld [vmem:[#allocation5 + $0x60] ss:$20 sps:$4 sm:$0xff]  }
  0xaa   :  { %1451 = vmatprep.subr.bf16.mxu0 %v3090_v59  ;;  %1574 = vmatprep.subr.bf16.mxu1 %v3093_v60  ;;  %v3165_v58 = vld [vmem:[#allocation5 + $0x2e0] ss:$20 sps:$4 sm:$0xff]   ;;  %v3166_v59 = vld [vmem:[#allocation5 + $0x1c8] ss:$20 sps:$4 sm:$0xff]  }
  0xab   :  { %v3168_v60 = vld [vmem:[#allocation5 + $0x448] ss:$20 sps:$4 sm:$0xff]  }
  0xad   :  { %1452 = vmatpush1.bf16.msra.mxu0 %v3088_v61  ;;  %1575 = vmatpush1.bf16.msra.mxu1 %v3091_v62  ;;  %v3167_v61 = vld [vmem:[#allocation5 + $0x88] ss:$20 sps:$4 sm:$0xff]  }
  0xae   :  { %1453 = vmatprep.subr.bf16.mxu0 %v3096_v63  ;;  %1576 = vmatprep.subr.bf16.mxu1 %v3099_v0  ;;  %v3169_v62 = vld [vmem:[#allocation5 + $0x308] ss:$20 sps:$4 sm:$0xff]   ;;  %v3170_v63 = vld [vmem:[#allocation5 + $0x1f0] ss:$20 sps:$4 sm:$0xff]  }
  0xaf   :  { %v3172_v0 = vld [vmem:[#allocation5 + $0x470] ss:$20 sps:$4 sm:$0xff]  }
  0xb1   :  { %1454 = vmatpush1.bf16.msra.mxu0 %v3094_v1  ;;  %1577 = vmatpush1.bf16.msra.mxu1 %v3097_v2  ;;  %v3171_v1 = vld [vmem:[#allocation5 + $0xb0] ss:$20 sps:$4 sm:$0xff]   ;;  %v3176_v2 = vld [vmem:[#allocation5 + $0x498] ss:$20 sps:$4 sm:$0xff]  }
  0xb2   :  { %1455 = vmatprep.subr.bf16.mxu0 %v3102_v3  ;;  %1578 = vmatprep.subr.bf16.mxu1 %v3105_v4  ;;  %v3175_v3 = vld [vmem:[#allocation5 + $0xd8] ss:$20 sps:$4 sm:$0xff]  }
  0xb3   :  { %v3177_v4 = vld [vmem:[#allocation5 + $0x358] ss:$20 sps:$4 sm:$0xff]  }
  0xb5   :  { %1456 = vmatpush1.bf16.msra.mxu0 %v3100_v6  ;;  %1579 = vmatpush1.bf16.msra.mxu1 %v3103_v7  ;;  %v3178_v6 = vld [vmem:[#allocation5 + $0x240] ss:$20 sps:$4 sm:$0xff]  }
  0xb6   :  { %1466 = vmatprep.subr.bf16.mxu0 %v3108_v8  ;;  %1589 = vmatprep.subr.bf16.mxu1 %v3111_v10  ;;  %v3180_v7 = vld [vmem:[#allocation5 + $0x4c0] ss:$20 sps:$4 sm:$0xff]   ;;  %v3182_v10 = vld [vmem:[#allocation5 + $0x268] ss:$20 sps:$4 sm:$0xff]  }
  0xb7   :  { %v3179_v8 = vld [vmem:[#allocation5 + $0x100] ss:$20 sps:$4 sm:$0xff]  }
  0xb8   :  { %1458 = vmatmul.mubr.bf16.vlgmr.msra.gmra.mrb[0].mxu0 %v3438_v13  ;;  %1581 = vmatmul.mubr.bf16.vlgmr.msra.gmra.mrb[0].mxu1 %v3438_v13 }
  0xb9   :  { %1467 = vmatpush1.bf16.msra.mxu0 %v3106_v11  ;;  %1590 = vmatpush1.bf16.msra.mxu1 %v3109_v12  ;;  %v3184_v11 = vld [vmem:[#allocation5 + $0x4e8] ss:$20 sps:$4 sm:$0xff]  }
  0xba   :  { %1468 = vmatprep.subr.bf16.mxu0 %v3114_v14  ;;  %1591 = vmatprep.subr.bf16.mxu1 %v3117_v15  ;;  %v3183_v12 = vld [vmem:[#allocation5 + $0x128] ss:$20 sps:$4 sm:$0xff]   ;;  %v3186_v15 = vld [vmem:[#allocation5 + $0x510] ss:$20 sps:$4 sm:$0xff]  }
  0xbb   :  { %1498 = vmatprep.mubr.bf16.mxu0 %v3345_v21  ;;  %1621 = vmatprep.mubr.bf16.mxu1 %v3345_v21  ;;  %v3185_v14 = vld [vmem:[#allocation5 + $0x3a8] ss:$20 sps:$4 sm:$0xff]  }
  0xbc   :  { %v3193_v21 = vld [vmem:[#allocation5 + $0x628] ss:$20 sps:$4 sm:$0xff]  }
  0xbd   :  { %1469 = vmatpush1.bf16.msra.mxu0 %v3112_v16  ;;  %1592 = vmatpush1.bf16.msra.mxu1 %v3115_v17  ;;  %v3346_v16 = vmov 0.0   ;;  %v3187_v17 = vld [vmem:[#allocation5 + $0x538] ss:$20 sps:$4 sm:$0xff]  }
  0xbe   :  { %1470 = vmatprep.subr.bf16.mxu0 %v3120_v18  ;;  %1593 = vmatprep.subr.bf16.mxu1 %v3123_v19  ;;  %v3188_v18 = vld [vmem:[#allocation5 + $0x560] ss:$20 sps:$4 sm:$0xff]   ;;  %v3189_v19 = vld [vmem:[#allocation5 + $0x588] ss:$20 sps:$4 sm:$0xff]  }
  0xc1   :  { %1471 = vmatpush1.bf16.msra.mxu0 %v3118_v20  ;;  %1594 = vmatpush1.bf16.msra.mxu1 %v3121_v22  ;;  %v3192_v20 = vld [vmem:[#allocation5 + $0x600] ss:$20 sps:$4 sm:$0xff]  }
  0xc2   :  { %1472 = vmatprep.subr.bf16.mxu0 %v3126_v23  ;;  %1595 = vmatprep.subr.bf16.mxu1 %v3129_v24  ;;  %v3194_v22 = vld [vmem:[#allocation7 + $0x40] sm:$0xff]  }
  0xc3   :  { %v3195_v23 = vld [vmem:[#allocation7] sm:$0xff]  }
  0xc4   :  { %v3196_v24 = vld [vmem:[#allocation7 + $0xc0] sm:$0xff]  }
  0xc5   :  { %1473 = vmatpush1.bf16.msra.mxu0 %v3124_v25  ;;  %1596 = vmatpush1.bf16.msra.mxu1 %v3127_v26  ;;  %v3197_v25 = vld [vmem:[#allocation7 + $0x80] sm:$0xff]   ;;  %v3198_v26 = vld [vmem:[#allocation7 + $0x48] sm:$0xff]  }
  0xc6   :  { %1474 = vmatprep.subr.bf16.mxu0 %v3132_v27  ;;  %1597 = vmatprep.subr.bf16.mxu1 %v3135_v28  ;;  %v3199_v27 = vld [vmem:[#allocation7 + $0x8] sm:$0xff]  }
  0xc7   :  { %v3200_v28 = vld [vmem:[#allocation7 + $0xc8] sm:$0xff]  }
  0xc9   :  { %1475 = vmatpush1.bf16.msra.mxu0 %v3130_v29  ;;  %1598 = vmatpush1.bf16.msra.mxu1 %v3133_v30  ;;  %v3201_v29 = vld [vmem:[#allocation7 + $0x88] sm:$0xff]   ;;  %v3202_v30 = vld [vmem:[#allocation7 + $0x50] sm:$0xff]  }
  0xca   :  { %1476 = vmatprep.subr.bf16.mxu0 %v3138_v31  ;;  %1599 = vmatprep.subr.bf16.mxu1 %v3141_v33  ;;  %v3203_v31 = vld [vmem:[#allocation7 + $0x10] sm:$0xff]  }
  0xcb   :  { %v3204_v33 = vld [vmem:[#allocation7 + $0xd0] sm:$0xff]  }
  0xcd   :  { %1477 = vmatpush1.bf16.msra.mxu0 %v3136_v34  ;;  %1600 = vmatpush1.bf16.msra.mxu1 %v3139_v35  ;;  %v3205_v34 = vld [vmem:[#allocation7 + $0x90] sm:$0xff]   ;;  %v319_v35 = vlaneseq }
  0xce   :  { %1478 = vmatprep.subr.bf16.mxu0 %v3144_v36  ;;  %1601 = vmatprep.subr.bf16.mxu1 %v3147_v37  ;;  %v3206_v36 = vld [vmem:[#allocation7 + $0x58] sm:$0xff]  }
  0xcf   :  { %v3207_v37 = vld [vmem:[#allocation7 + $0x18] sm:$0xff]  }
  0xd1   :  { %1479 = vmatpush1.bf16.msra.mxu0 %v3142_v38  ;;  %1602 = vmatpush1.bf16.msra.mxu1 %v3145_v39  ;;  %v3208_v38 = vld [vmem:[#allocation7 + $0xd8] sm:$0xff]  }
  0xd2   :  { %1480 = vmatprep.subr.bf16.mxu0 %v3150_v40  ;;  %1603 = vmatprep.subr.bf16.mxu1 %v3153_v41  ;;  %v3209_v39 = vld [vmem:[#allocation7 + $0x98] sm:$0xff]   ;;  %v3461_v40 = vshrl.u32 %v319_v35, 7  ;;  %v3210_v41 = vld [vmem:[#allocation7 + $0x60] sm:$0xff]  }
  0xd5   :  { %1481 = vmatpush1.bf16.msra.mxu0 %v3148_v42  ;;  %1604 = vmatpush1.bf16.msra.mxu1 %v3151_v43  ;;  %v3211_v42 = vld [vmem:[#allocation7 + $0x20] sm:$0xff]  }
  0xd6   :  { %2736 = vmatprep.subr.bf16.mxu0 %v3154_v45  ;;  %2758 = vmatprep.subr.bf16.mxu1 %v3156_v46  ;;  %v3212_v43 = vld [vmem:[#allocation7 + $0xe0] sm:$0xff]   ;;  %v3464_v45 = vsub.s32 0, %v3461_v40  ;;  %v3467_v46 = vsub.s32 2, %v3461_v40 }
  0xd8   :  { %1499 = vmatmul.mubr.bf16.vlgmr.msra.gmra.mrb[0].mxu0 %v3442_v50  ;;  %1622 = vmatmul.mubr.bf16.vlgmr.msra.gmra.mrb[0].mxu1 %v3442_v50 }
  0xd9   :  { %2737 = vmatpush3.bf16.msra.mxu0 %v3155_v47  ;;  %2759 = vmatpush3.bf16.msra.mxu1 %v3157_v49  ;;  %v3214_v47 = vld [vmem:[#allocation7 + $0x68] sm:$0xff]   ;;  %v3472_v49 = vld [vmem:[%s3597_s2] sm:$0x1f] }
  0xda   :  { %2738 = vmatprep.subr.bf16.mxu0 %v3158_v51  ;;  %2760 = vmatprep.subr.bf16.mxu1 %v3160_v52  ;;  %v3478_v51 = vsub.s32 3, %v3461_v40  ;;  %v3215_v52 = vld [vmem:[#allocation7 + $0x28] sm:$0xff]  }
  0xdb   :  { %1662 = vmatprep.mubr.bf16.mxu0 %v3426_v48  ;;  %1702 = vmatprep.mubr.bf16.mxu1 %v3434_v32  ;;  %v3173_v48 = vld [vmem:[#allocation5 + $0x330] ss:$20 sps:$4 sm:$0xff]   ;;  %v3174_v32 = vld [vmem:[#allocation5 + $0x218] ss:$20 sps:$4 sm:$0xff]  }
  0xdd   :  { %2739 = vmatpush3.bf16.msra.mxu0 %v3159_v53  ;;  %2761 = vmatpush3.bf16.msra.mxu1 %v3161_v54  ;;  %v3216_v53 = vld [vmem:[#allocation7 + $0xe8] sm:$0xff]  }
  0xde   :  { %2740 = vmatprep.subr.bf16.mxu0 %v3162_v55  ;;  %2762 = vmatprep.subr.bf16.mxu1 %v3164_v56  ;;  %v3217_v54 = vld [vmem:[#allocation7 + $0xa8] sm:$0xff]   ;;  %v322_v55 = vrot.slane %v3472_v49, %v3464_v45  ;;  %v330_v56 = vrot.slane %v3472_v49, %v3467_v46 }
  0xe1   :  { %2741 = vmatpush3.bf16.msra.mxu0 %v3163_v57  ;;  %2763 = vmatpush3.bf16.msra.mxu1 %v3165_v58  ;;  %v3218_v57 = vld [vmem:[#allocation7 + $0x70] sm:$0xff]  }
  0xe2   :  { %2742 = vmatprep.subr.bf16.mxu0 %v3166_v59  ;;  %2764 = vmatprep.subr.bf16.mxu1 %v3168_v60  ;;  %v334_v59 = vrot.slane %v3472_v49, %v3478_v51  ;;  %v3219_v60 = vld [vmem:[#allocation7 + $0x30] sm:$0xff]  }
  0xe5   :  { %2743 = vmatpush3.bf16.msra.mxu0 %v3167_v61  ;;  %2765 = vmatpush3.bf16.msra.mxu1 %v3169_v62  ;;  %v3220_v61 = vld [vmem:[#allocation7 + $0xf0] sm:$0xff]  }
  0xe6   :  { %2744 = vmatprep.subr.bf16.mxu0 %v3170_v63  ;;  %2766 = vmatprep.subr.bf16.mxu1 %v3172_v0  ;;  %v3221_v62 = vld [vmem:[#allocation7 + $0xb0] sm:$0xff]   ;;  %v3222_v63 = vld [vmem:[#allocation7 + $0x78] sm:$0xff]  }
  0xe7   :  { %v3224_v0 = vld [vmem:[#allocation7 + $0xf8] sm:$0xff]  }
  0xe9   :  { %2745 = vmatpush3.bf16.msra.mxu0 %v3171_v1  ;;  %2767 = vmatpush3.bf16.msra.mxu1 %v3173_v48 }
  0xea   :  { %2746 = vmatprep.subr.bf16.mxu0 %v3174_v32  ;;  %2768 = vmatprep.subr.bf16.mxu1 %v3176_v2  ;;  %v3223_v32 = vld [vmem:[#allocation7 + $0x38] sm:$0xff]  }
  0xed   :  { %2747 = vmatpush3.bf16.msra.mxu0 %v3175_v3  ;;  %2769 = vmatpush3.bf16.msra.mxu1 %v3177_v4 }
  0xee   :  { %2748 = vmatprep.subr.bf16.mxu0 %v3178_v6  ;;  %2770 = vmatprep.subr.bf16.mxu1 %v3180_v7  ;;  %v3225_v7 = vld [vmem:[#allocation7 + $0xb8] sm:$0xff]  }
  0xf1   :  { %2749 = vmatpush3.bf16.msra.mxu0 %v3179_v8  ;;  %2771 = vmatpush3.bf16.msra.mxu1 %v3181_v9 }
  0xf2   :  { %2750 = vmatprep.subr.bf16.mxu0 %v3182_v10  ;;  %2772 = vmatprep.subr.bf16.mxu1 %v3184_v11 }
  0xf5   :  { %2751 = vmatpush3.bf16.msra.mxu0 %v3183_v12  ;;  %2773 = vmatpush3.bf16.msra.mxu1 %v3185_v14 }
  0xf6   :  { %2842 = vmatprep.subr.bf16.mxu0 %v3346_v16  ;;  %2789 = vmatprep.subr.bf16.mxu1 %v3194_v22 }
  0xf8   :  { %1663 = vmatmul.mubr.bf16.vlgmr.msra.gmra.mrb[4].mxu0 %v3430_v5  ;;  %1703 = vmatmul.mubr.bf16.vlgmr.msra.gmra.mrb[4].mxu1 %v3438_v13  ;;  %v3190_v5 = vld [vmem:[#allocation5 + $0x5b0] ss:$20 sps:$4 sm:$0xff]   ;;  %v3191_v13 = vld [vmem:[#allocation5 + $0x5d8] ss:$20 sps:$4 sm:$0xff]  }
  0xf9   :  { %2843 = vmatpush3.bf16.msra.mxu0 %v3186_v15  ;;  %2858 = vmatprep.mubr.msk.bf16.mxu0 %vm3347_vm0, %v3346_v16 }
  0xfa   :  { %2844 = vmatprep.subr.bf16.mxu0 %v3346_v16  ;;  %2790 = vmatpush3.bf16.msra.mxu1 %v3195_v23 }
  0xfb   :  { %2791 = vmatprep.subr.bf16.mxu1 %v3198_v26 }
  0xfd   :  { %2845 = vmatpush3.bf16.msra.mxu0 %v3187_v17 }
  0xfe   :  { %2846 = vmatprep.subr.bf16.mxu0 %v3346_v16  ;;  %2792 = vmatpush3.bf16.msra.mxu1 %v3199_v27 }
  0xff   :  { %2793 = vmatprep.subr.bf16.mxu1 %v3202_v30 }
 0x101   :  { %2847 = vmatpush3.bf16.msra.mxu0 %v3188_v18 }
 0x102   :  { %2848 = vmatprep.subr.bf16.mxu0 %v3346_v16  ;;  %2794 = vmatpush3.bf16.msra.mxu1 %v3203_v31 }
 0x103   :  { %2795 = vmatprep.subr.bf16.mxu1 %v3206_v36 }
 0x105   :  { %2849 = vmatpush3.bf16.msra.mxu0 %v3189_v19 }
 0x106   :  { %2850 = vmatprep.subr.bf16.mxu0 %v3346_v16  ;;  %2796 = vmatpush3.bf16.msra.mxu1 %v3207_v37 }
 0x107   :  { %2797 = vmatprep.subr.bf16.mxu1 %v3210_v41 }
 0x109   :  { %2851 = vmatpush3.bf16.msra.mxu0 %v3190_v5 }
 0x10a   :  { %2852 = vmatprep.subr.bf16.mxu0 %v3346_v16  ;;  %2798 = vmatpush3.bf16.msra.mxu1 %v3211_v42 }
 0x10b   :  { %2799 = vmatprep.subr.bf16.mxu1 %v3214_v47 }
 0x10d   :  { %2853 = vmatpush3.bf16.msra.mxu0 %v3191_v13 }
 0x10e   :  { %2854 = vmatprep.subr.bf16.mxu0 %v3346_v16  ;;  %2800 = vmatpush3.bf16.msra.mxu1 %v3215_v52 }
 0x10f   :  { %2801 = vmatprep.subr.bf16.mxu1 %v3218_v57 }
 0x111   :  { %2855 = vmatpush3.bf16.msra.mxu0 %v3192_v20 }
 0x112   :  { %2856 = vmatprep.subr.bf16.mxu0 %v3346_v16  ;;  %2802 = vmatpush3.bf16.msra.mxu1 %v3219_v60 }
 0x113   :  { %2803 = vmatprep.subr.bf16.mxu1 %v3222_v63 }
 0x115   :  { %2857 = vmatpush3.bf16.msra.mxu0 %v3193_v21 }
 0x116   :  { %2811 = vmatprep.subr.bf16.mxu0 %v3196_v24  ;;  %2804 = vmatpush3.bf16.msra.mxu1 %v3223_v32 }
 0x117   :  { %2862 = vmatprep.subr.bf16.mxu1 %v3346_v16 }
 0x118   :  { %2859 = vmatmul.mubr.bf16.vlgmr.msra.gmra.mrb[8].mxu0 %v3442_v50  ;;  %v3475_v50 = vsub.s32 1, %v3461_v40 }
 0x119   :  { %2812 = vmatpush3.bf16.msra.mxu0 %v3197_v25 }
 0x11a   :  { %2813 = vmatprep.subr.bf16.mxu0 %v3200_v28  ;;  %v326_v58 = vrot.slane %v3472_v49, %v3475_v50 }
 0x11d   :  { %2814 = vmatpush3.bf16.msra.mxu0 %v3201_v29 }
 0x11e   :  { %2815 = vmatprep.subr.bf16.mxu0 %v3204_v33 }
 0x121   :  { %2816 = vmatpush3.bf16.msra.mxu0 %v3205_v34 }
 0x122   :  { %2817 = vmatprep.subr.bf16.mxu0 %v3208_v38 }
 0x125   :  { %2818 = vmatpush3.bf16.msra.mxu0 %v3209_v39 }
 0x126   :  { %2819 = vmatprep.subr.bf16.mxu0 %v3212_v43 }
 0x129   :  { %2820 = vmatpush3.bf16.msra.mxu0 %v3213_v44 }
 0x12a   :  { %2821 = vmatprep.subr.bf16.mxu0 %v3216_v53 }
 0x12d   :  { %2822 = vmatpush3.bf16.msra.mxu0 %v3217_v54 }
 0x12e   :  { %2823 = vmatprep.subr.bf16.mxu0 %v3220_v61 }
 0x131   :  { %2824 = vmatpush3.bf16.msra.mxu0 %v3221_v62 }
 0x132   :  { %2825 = vmatprep.subr.bf16.mxu0 %v3224_v0 }
 0x135   :  { %2826 = vmatpush3.bf16.msra.mxu0 %v3225_v7 }
 0x1ab   :  { %v1500_v1 = vpop.f32.mrb[0].mxu0  ;;  %v1623_v48 = vpop.f32.mrb[0].mxu1 }
 0x1ac   :  { %v3488_v2 = vadd.f32 %v1500_v1, %v322_v55  ;;  %v3490_v3 = vadd.f32 %v1623_v48, %v330_v56  ;;  %v1502_v4 = vpop.f32.mrb[1].mxu0  ;;  %v1625_v6 = vpop.f32.mrb[1].mxu1 }
 0x1ad   :  { %v3492_v8 = vadd.f32 %v1502_v4, %v326_v58  ;;  %v3494_v9 = vadd.f32 %v1625_v6, %v334_v59  ;;  %v1504_v10 = vpop.f32.mrb[2].mxu0  ;;  %v1627_v11 = vpop.f32.mrb[2].mxu1 }
 0x1ae   :  { %v1750_v12 = vrot.slane %v3488_v2, 4  ;;  %v1780_v14 = vmul.f32 %v3488_v2, %v3488_v2  ;;  %v1762_v15 = vrot.slane %v3490_v3, 4  ;;  %v1782_v17 = vmul.f32 %v3490_v3, %v3490_v3  ;;  %v1505_v18 = vpop.f32.mrb[3].mxu0  ;;  %v1628_v19 = vpop.f32.mrb[3].mxu1 }
 0x1af   :  { %v1756_v5 = vrot.slane %v3492_v8, 4  ;;  %v1781_v13 = vmul.f32 %v3492_v8, %v3492_v8  ;;  %v1768_v20 = vrot.slane %v3494_v9, 4  ;;  %v1783_v21 = vmul.f32 %v3494_v9, %v3494_v9 }
 0x1b0   :  { %v1751_v22 = vadd.f32 %v3488_v2, %v1750_v12  ;;  %v1785_v23 = vrot.slane %v1780_v14, 4  ;;  %v1763_v24 = vadd.f32 %v3490_v3, %v1762_v15  ;;  %v1797_v25 = vrot.slane %v1782_v17, 4 }
 0x1b1   :  { %v1757_v26 = vadd.f32 %v3492_v8, %v1756_v5  ;;  %v1791_v27 = vrot.slane %v1781_v13, 4  ;;  %v1769_v28 = vadd.f32 %v3494_v9, %v1768_v20  ;;  %v1803_v29 = vrot.slane %v1783_v21, 4 }
 0x1b2   :  { %v1752_v30 = vrot.slane %v1751_v22, 2  ;;  %v1786_v31 = vadd.f32 %v1785_v23, %v1780_v14  ;;  %v1764_v33 = vrot.slane %v1763_v24, 2  ;;  %v1798_v34 = vadd.f32 %v1797_v25, %v1782_v17 }
 0x1b3   :  { %v1758_v35 = vrot.slane %v1757_v26, 2  ;;  %v1792_v36 = vadd.f32 %v1791_v27, %v1781_v13  ;;  %v1770_v37 = vrot.slane %v1769_v28, 2  ;;  %v1804_v38 = vadd.f32 %v1803_v29, %v1783_v21 }
 0x1b4   :  { %v1753_v39 = vadd.f32 %v1752_v30, %v1751_v22  ;;  %v1787_v41 = vrot.slane %v1786_v31, 2  ;;  %v1765_v42 = vadd.f32 %v1764_v33, %v1763_v24  ;;  %v1799_v43 = vrot.slane %v1798_v34, 2 }
 0x1b5   :  { %v1759_v44 = vadd.f32 %v1758_v35, %v1757_v26  ;;  %v1793_v47 = vrot.slane %v1792_v36, 2  ;;  %v1771_v52 = vadd.f32 %v1770_v37, %v1769_v28  ;;  %v1805_v53 = vrot.slane %v1804_v38, 2 }
 0x1b6   :  { %v1754_v54 = vrot.slane %v1753_v39, 1  ;;  %v1788_v55 = vadd.f32 %v1787_v41, %v1786_v31  ;;  %v1766_v56 = vrot.slane %v1765_v42, 1  ;;  %v1800_v57 = vadd.f32 %v1799_v43, %v1798_v34 }
 0x1b7   :  { %v1760_v58 = vrot.slane %v1759_v44, 1  ;;  %v1794_v59 = vadd.f32 %v1793_v47, %v1792_v36  ;;  %v1772_v60 = vrot.slane %v1771_v52, 1  ;;  %v1806_v61 = vadd.f32 %v1805_v53, %v1804_v38 }
 0x1b8   :  { %v1755_v62 = vadd.f32 %v1754_v54, %v1753_v39  ;;  %v1789_v63 = vrot.slane %v1788_v55, 1  ;;  %v1767_v0 = vadd.f32 %v1766_v56, %v1765_v42  ;;  %v1801_v1 = vrot.slane %v1800_v57, 1 }
 0x1b9   :  { %v1761_v48 = vadd.f32 %v1760_v58, %v1759_v44  ;;  %v1795_v32 = vrot.slane %v1794_v59, 1  ;;  %v1773_v4 = vadd.f32 %v1772_v60, %v1771_v52  ;;  %v1807_v6 = vrot.slane %v1806_v61, 1 }
 0x1ba   :  { %v1790_v7 = vadd.f32 %v1789_v63, %v1788_v55  ;;  %v3513_v10 = vmul.f32 0.125, %v1755_v62  ;;  %v1802_v11 = vadd.f32 %v1801_v1, %v1800_v57  ;;  %v3515_v12 = vmul.f32 0.125, %v1767_v0 }
 0x1bb   :  { %v1796_v14 = vadd.f32 %v1795_v32, %v1794_v59  ;;  %v3517_v15 = vmul.f32 0.125, %v1761_v48  ;;  %v1808_v17 = vadd.f32 %v1807_v6, %v1806_v61  ;;  %v3519_v18 = vmul.f32 0.125, %v1773_v4 }
 0x1bc   :  { %v1820_v19 = vmul.f32 0.125, %v1790_v7  ;;  %v1825_v5 = vmul.f32 %v3513_v10, %v3513_v10  ;;  %v1822_v13 = vmul.f32 0.125, %v1802_v11  ;;  %v1827_v20 = vmul.f32 %v3515_v12, %v3515_v12 }
 0x1bd   :  { %v1821_v21 = vmul.f32 0.125, %v1796_v14  ;;  %v1826_v22 = vmul.f32 %v3517_v15, %v3517_v15  ;;  %v1823_v23 = vmul.f32 0.125, %v1808_v17  ;;  %v1828_v24 = vmul.f32 %v3519_v18, %v3519_v18 }
 0x1be   :  { %v1830_v25 = vsub.f32 %v1820_v19, %v1825_v5  ;;  %v1832_v26 = vsub.f32 %v1822_v13, %v1827_v20  ;;  %v3348_v38 = vmov 1966171168   ;;  %v3530_v41 = vsub.s32 4, %v3461_v40 }
 0x1bf   :  { %v1831_v27 = vsub.f32 %v1821_v21, %v1826_v22  ;;  %v1833_v28 = vsub.f32 %v1823_v23, %v1828_v24  ;;  %v1859_v39 = vunpack.c.l.s4 %v3348_v38 }
 0x1c0   :  { %v1835_v29 = vmax.f32 %v1830_v25, 0.0  ;;  %v1837_v30 = vmax.f32 %v1832_v26, 0.0  ;;  %v338_v44 = vrot.slane %v3472_v49, %v3530_v41 }
 0x1c1   :  { %v1836_v31 = vmax.f32 %v1831_v27, 0.0  ;;  %v1838_v33 = vmax.f32 %v1833_v28, 0.0  ;;  %v1860_v42 = vunpack.c.0.s8 %v1859_v39 }
 0x1c2   :  { %v1841_v34 = vadd.f32 1e-05, %v1835_v29  ;;  %v1843_v35 = vadd.f32 1e-05, %v1837_v30 }
 0x1c3   :  { %v1842_v36 = vadd.f32 1e-05, %v1836_v31  ;;  %v1844_v37 = vadd.f32 1e-05, %v1838_v33  ;;  %v3535_v62 = vsub.s32 %v1860_v42, %v3461_v40 }
 0x1c4   :  { %3234 = vrsqrt.f32 %v1841_v34 }
 0x1c5   :  { %3236 = vrsqrt.f32 %v1843_v35 }
 0x1c6   :  { %3238 = vrsqrt.f32 %v1842_v36 }
 0x1c7   :  { %3240 = vrsqrt.f32 %v1844_v37 }
 0x1cb   :  { %v2752_v43 = vpop.f32.mrb[4].mxu0  ;;  %v2774_v47 = vpop.f32.mrb[4].mxu1 }
 0x1cc   :  { %v2753_v52 = vpop.f32.mrb[5].mxu0  ;;  %v2775_v53 = vpop.f32.mrb[5].mxu1 }
 0x1cd   :  { %v2754_v54 = vadd.f32 %v2753_v52, %v2752_v43  ;;  %v2755_v55 = vpop.f32.mrb[6].mxu0  ;;  %v2776_v56 = vadd.f32 %v2775_v53, %v2774_v47  ;;  %v2777_v57 = vpop.f32.mrb[6].mxu1 }
 0x1ce   :  { %v3235_v58 = vpop.eup %3234  ;;  %v2756_v59 = vpop.f32.mrb[7].mxu0 }
 0x1cf   :  { %v2778_v60 = vpop.f32.mrb[7].mxu1  ;;  %v3237_v61 = vpop.eup %3236  ;;  %v1665_v63 = vadd.f32 %v2754_v54, %v338_v44  ;;  %v1840_v44 = vld [vmem:[%s3598_s3] sm:$0x1f] }
 0x1d0   :  { %v3239_v0 = vpop.eup %3238 }
 0x1d1   :  { %v3241_v1 = vpop.eup %3240  ;;  %v1856_v48 = vcombine.low %v3235_v58, %v3239_v0  ;;  %v1705_v32 = vadd.f32 %v2776_v56, %v1665_v63 }
 0x1d2   :  { %v1857_v49 = vcombine.low %v3237_v61, %v3241_v1 }
 0x1d3   :  { %v1864_v4 = vrot.slane %v1856_v48, %v3535_v62 }
 0x1d4   :  { %v1871_v6 = vrot.slane %v1857_v49, %v3535_v62 }
 0x1d6   :  { %v1879_v7 = vcombine.low %v1864_v4, %v1871_v6 }
 0x1d8   :  { %v1886_v42 = vrot.slane %v1879_v7, %v3535_v62 }
 0x1eb   :  { %v1744_v11 = vpop.f32.mrb[8].mxu0 }
 0x1ec   :  { %v1745_v14 = vadd.f32 %v1744_v11, %v1705_v32  ;;  %v2860_v17 = vpop.f32.mrb[9].mxu0 }
 0x1ed   :  { %v1747_v19 = vpop.f32.mrb[10].mxu0 }
 0x1ee   :  { %v1774_v5 = vrot.slane %v1745_v14, 4  ;;  %v1784_v13 = vmul.f32 %v1745_v14, %v1745_v14  ;;  %v2861_v20 = vpop.f32.mrb[11].mxu0 }
 0x1f0   :  { %v1775_v40 = vadd.f32 %v1774_v5, %v1745_v14  ;;  %v1809_v21 = vrot.slane %v1784_v13, 4 }
 0x1f2   :  { %v1776_v22 = vrot.slane %v1775_v40, 2  ;;  %v1810_v23 = vadd.f32 %v1809_v21, %v1784_v13 }
 0x1f4   :  { %v1777_v24 = vadd.f32 %v1776_v22, %v1775_v40  ;;  %v1811_v25 = vrot.slane %v1810_v23, 2 }
 0x1f6   :  { %v1778_v26 = vrot.slane %v1777_v24, 1  ;;  %v1812_v27 = vadd.f32 %v1811_v25, %v1810_v23 }
 0x1f8   :  { %v1779_v28 = vadd.f32 %v1778_v26, %v1777_v24  ;;  %v1813_v29 = vrot.slane %v1812_v27, 1 }
 0x1fa   :  { %v1814_v30 = vadd.f32 %v1813_v29, %v1812_v27  ;;  %v1819_v31 = vmul.f32 0.125, %v1779_v28 }
 0x1fc   :  { %v1824_v33 = vmul.f32 0.125, %v1814_v30  ;;  %v1829_v34 = vmul.f32 %v1819_v31, %v1819_v31  ;;  %v3227_v30 = vld [vmem:[#allocation7 + $0x108] sm:$0xff]  }
 0x1fe   :  { %v1834_v35 = vsub.f32 %v1824_v33, %v1829_v34  ;;  %v3229_v33 = vld [vmem:[#allocation7 + $0x118] sm:$0xff]   ;;  %v3230_v34 = vld [vmem:[#allocation7 + $0x120] sm:$0xff]  }
 0x200   :  { %v1839_v36 = vmax.f32 %v1834_v35, 0.0  ;;  %v3231_v35 = vld [vmem:[#allocation7 + $0x128] sm:$0xff]  }
 0x202   :  { %v1845_v37 = vadd.f32 1e-05, %v1839_v36  ;;  %v3232_v36 = vld [vmem:[#allocation7 + $0x130] sm:$0xff]  }
 0x204   :  { %3242 = vrsqrt.f32 %v1845_v37 }
 0x20e   :  { %v3243_v38 = vpop.eup %3242 }
 0x20f   :  { %v1878_v39 = vrot.slane %v3243_v38, %v3535_v62  ;;  %v3233_v38 = vld [vmem:[#allocation7 + $0x138] sm:$0xff]  }
 0x211   :  { %v1893_v43 = vrot.slane %v1878_v39, %v3535_v62 }
 0x213   :  { %v1894_v47 = vcombine.low %v1886_v42, %v1893_v43 }
 0x215   :  { %v1896_v52 = vmul.f32 %v1894_v47, %v1840_v44  ;;  %v2695_v47 = vld [vmem:[%s3601_s6] ss:$0 sm:$0xff]  ;;  %s3310_s6 = scalar_lea.vmem %s2486_s21, 128 }
 0x216   :  { %p3311_p10 = scmp.ne.s32.totalorder %s2486_s21, %s3310_s6  ;;  %p3316_p12 = scmp.lt.s32.totalorder %s3310_s6, %s3310_s6 }
 0x217   :  { %v1902_v53 = vrot.slane %v1896_v52, %v3464_v45  ;;  %v1906_v54 = vrot.slane %v1896_v52, %v3475_v50  ;;  %v1910_v55 = vrot.slane %v1896_v52, %v3467_v46  ;;  %v1914_v56 = vrot.slane %v1896_v52, %v3478_v51 }
 0x218   :  { %v1918_v57 = vrot.slane %v1896_v52, %v3530_v41  ;;  %p3317_p13 = por %p3316_p12, %p3315_p11 }
 0x219   :  { %v1924_v58 = vmul.f32 %v1902_v53, %v3513_v10  ;;  %v1925_v59 = vmul.f32 %v1906_v54, %v3517_v15  ;;  %v1926_v60 = vmul.f32 %v1910_v55, %v3515_v12  ;;  %v1927_v61 = vmul.f32 %v1914_v56, %v3519_v18 }
 0x21a   :  { %v1928_v63 = vmul.f32 %v1918_v57, %v1819_v31  ;;  %v1979_v0 = vmul.f32 %v1918_v57, %v1745_v14  ;;  %v1976_v1 = vmul.f32 %v3492_v8, %v1906_v54  ;;  %v1978_v48 = vmul.f32 %v3494_v9, %v1914_v56  ;;  %v1897_v8 = vld [vmem:[%s3599_s4] sm:$0x1f]  ;;  %v3228_v31 = vld [vmem:[#allocation7 + $0x110] sm:$0xff]   ;;  %p3318_p0 = pnand %p3317_p13, %p3311_p10 }
 0x21b   :  { %v1934_v32 = vcombine.low %v1924_v58, %v1925_v59  ;;  %v1935_v49 = vcombine.low %v1926_v60, %v1927_v61  ;;  %v1975_v4 = vmul.f32 %v3488_v2, %v1902_v53  ;;  %v1977_v6 = vmul.f32 %v3490_v3, %v1910_v55 }
 0x21c   :  { %v1956_v12 = vrot.slane %v1928_v63, %v3535_v62 }
 0x21d   :  { %v1942_v10 = vrot.slane %v1934_v32, %v3535_v62  ;;  %v1949_v15 = vrot.slane %v1935_v49, %v3535_v62 }
 0x21e   :  { %v1971_v11 = vrot.slane %v1956_v12, %v3535_v62 }
 0x21f   :  { %v1957_v7 = vcombine.low %v1942_v10, %v1949_v15 }
 0x221   :  { %v1964_v18 = vrot.slane %v1957_v7, %v3535_v62 }
 0x223   :  { %v1972_v9 = vcombine.low %v1964_v18, %v1971_v11 }
 0x225   :  { %v1974_v14 = vsub.f32 %v1897_v8, %v1972_v9 }
 0x227   :  { %v2000_v2 = vrot.slane %v1974_v14, %v3530_v41  ;;  %v1988_v3 = vrot.slane %v1974_v14, %v3475_v50  ;;  %v1996_v17 = vrot.slane %v1974_v14, %v3478_v51  ;;  %v1984_v19 = vrot.slane %v1974_v14, %v3464_v45 }
 0x228   :  { %v1992_v5 = vrot.slane %v1974_v14, %v3467_v46  ;;  %v3226_v46 = vld [vmem:[#allocation7 + $0x100] sm:$0xff]  }
 0x229   :  { %v2010_v13 = vadd.f32 %v2000_v2, %v1979_v0  ;;  %v2007_v20 = vadd.f32 %v1988_v3, %v1976_v1  ;;  %v2009_v40 = vadd.f32 %v1996_v17, %v1978_v48  ;;  %v2006_v62 = vadd.f32 %v1984_v19, %v1975_v4 }
 0x22a   :  { %v2008_v21 = vadd.f32 %v1992_v5, %v1977_v6 }
 0x22b   :  { %vm2012_vm1 = vcmp.ge.f32.partialorder %v2007_v20, 0.0  ;;  %v2017_v22 = vmul.f32 0.01, %v2007_v20  ;;  %vm2014_vm2 = vcmp.ge.f32.partialorder %v2009_v40, 0.0  ;;  %v2019_v23 = vmul.f32 0.01, %v2009_v40 }
 0x22c   :  { %vm2011_vm3 = vcmp.ge.f32.partialorder %v2006_v62, 0.0  ;;  %v2016_v24 = vmul.f32 0.01, %v2006_v62  ;;  %vm2013_vm4 = vcmp.ge.f32.partialorder %v2008_v21, 0.0  ;;  %v2018_v41 = vmul.f32 0.01, %v2008_v21 }
 0x22d   :  { %v2022_v50 = vsel %vm2012_vm1, %v2007_v20, %v2017_v22  ;;  %v2024_v25 = vsel %vm2014_vm2, %v2009_v40, %v2019_v23  ;;  %v2020_v37 = vmul.f32 0.01, %v2010_v13  ;;  %vm2015_vm5 = vcmp.ge.f32.partialorder %v2010_v13, 0.0 }
 0x22e   :  { %v2027_v51 = vpack.c.bf16 %v2022_v50, %v2022_v50  ;;  %v2029_v26 = vpack.c.bf16 %v2024_v25, %v2024_v25  ;;  %v2021_v45 = vsel %vm2011_vm3, %v2006_v62, %v2016_v24  ;;  %v2023_v27 = vsel %vm2013_vm4, %v2008_v21, %v2018_v41 }
 0x22f   :  { %v2026_v28 = vpack.c.bf16 %v2021_v45, %v2021_v45  ;;  %v2028_v29 = vpack.c.bf16 %v2023_v27, %v2023_v27  ;;  %v2025_v39 = vsel %vm2015_vm5, %v2010_v13, %v2020_v37 }
 0x230   :  { %2390 = vmatprep.mubr.bf16.mxu1 %v2027_v51  ;;  %2430 = vmatprep.mubr.bf16.mxu0 %v2029_v26  ;;  %v2030_v42 = vpack.c.bf16 %v2025_v39, %v2025_v39 }
 0x231   :  { %2391 = vmatmul.mubr.bf16.vlgmr.msra.gmra.mrb[8].mxu1 %v2026_v28  ;;  %2431 = vmatmul.mubr.bf16.vlgmr.msra.gmra.mrb[12].mxu0 %v2028_v29 }
 0x232   :  { %2863 = vmatpush3.bf16.msra.mxu1 %v3226_v46  ;;  %2878 = vmatprep.mubr.msk.bf16.mxu1 %vm3347_vm0, %v3346_v16 }
 0x233   :  { %2864 = vmatprep.subr.bf16.mxu1 %v3346_v16 }
 0x236   :  { %2865 = vmatpush3.bf16.msra.mxu1 %v3227_v30 }
 0x237   :  { %2866 = vmatprep.subr.bf16.mxu1 %v3346_v16 }
 0x23a   :  { %2867 = vmatpush3.bf16.msra.mxu1 %v3228_v31 }
 0x23b   :  { %2868 = vmatprep.subr.bf16.mxu1 %v3346_v16 }
 0x23e   :  { %2869 = vmatpush3.bf16.msra.mxu1 %v3229_v33 }
 0x23f   :  { %2870 = vmatprep.subr.bf16.mxu1 %v3346_v16 }
 0x242   :  { %2871 = vmatpush3.bf16.msra.mxu1 %v3230_v34 }
 0x243   :  { %2872 = vmatprep.subr.bf16.mxu1 %v3346_v16 }
 0x246   :  { %2873 = vmatpush3.bf16.msra.mxu1 %v3231_v35 }
 0x247   :  { %2874 = vmatprep.subr.bf16.mxu1 %v3346_v16 }
 0x24a   :  { %2875 = vmatpush3.bf16.msra.mxu1 %v3232_v36 }
 0x24b   :  { %2876 = vmatprep.subr.bf16.mxu1 %v3346_v16 }
 0x24e   :  { %2877 = vmatpush3.bf16.msra.mxu1 %v3233_v38 }
 0x251   :  { %2879 = vmatmul.mubr.bf16.vlgmr.msra.gmra.mrb[12].mxu1 %v2030_v42 }
 0x304   :  { %v2805_v43 = vpop.f32.mrb[8].mxu1  ;;  %v2827_v44 = vpop.f32.mrb[12].mxu0 }
 0x305   :  { %v2806_v52 = vpop.f32.mrb[9].mxu1  ;;  %v2828_v53 = vpop.f32.mrb[13].mxu0 }
 0x306   :  { %v2807_v54 = vadd.f32 %v2806_v52, %v2805_v43  ;;  %v2829_v55 = vadd.f32 %v2828_v53, %v2827_v44  ;;  %v2808_v56 = vpop.f32.mrb[10].mxu1  ;;  %v2830_v57 = vpop.f32.mrb[14].mxu0 }
 0x307   :  { %v2809_v58 = vpop.f32.mrb[11].mxu1  ;;  %v2831_v59 = vpop.f32.mrb[15].mxu0 }
 0x308   :  { %v2393_v60 = vadd.f32 %v2807_v54, %v2695_v47 }
 0x30a   :  { %v2433_v16 = vadd.f32 %v2829_v55, %v2393_v60 }
 0x324   :  { %v2472_v61 = vpop.f32.mrb[12].mxu1 }
 0x325   :  { %v2473_v63 = vadd.f32 %v2472_v61, %v2433_v16  ;;  %v2880_v0 = vpop.f32.mrb[13].mxu1 }
 0x326   :  { %v2475_v1 = vpop.f32.mrb[14].mxu1 }
 0x327   :  { %2478 = vst [vmem:[#allocation8] sm:$0xff] %v2473_v63  ;;  %v2881_v48 = vpop.f32.mrb[15].mxu1 }
 0x328   :  { %3321 = shalt.err (!%p3318_p0)
}
 0x329   :  { %s3322_s24 = scalar_lea.hbm %s3602_s7, 128 }
 0x32a   :  { %p3323_p1 = scmp.ne.s32.totalorder %s3602_s7, %s3322_s24  ;;  %p3326_p2 = scmp.lt.u32.totalorder %s3322_s24, %s3602_s7 }
 0x32c   :  { %p3328_p3 = pnand %p3326_p2, %p3323_p1 }
 0x32e   :  { %3331 = shalt.err (!%p3328_p3)
}
 0x32f   :  { %2488 = dma.vmem_to_hbm [thread:$0]  %s2486_s21, 128, %s3602_s7, [#allocation4]  }
 0x330   :  { %3336 = dma.done.wait [#allocation4], 128  }
 0x331   :  { %3337 = vsyncadd [#allocation4], 4294967168 }
 0x332   :  { %2492 = vsyncpa [#allocation3], 1 }
 0x333   :  { %2493 = vsyncpa [#allocation6], 1 }
 0x334   :  { %2494 = vsyncpa [#allocation4], 1 }

</bundles_post_ra>
